<compile_context>
chip_gen: v7x
topology: tpu7x:2x2x1
jax: 0.10.0
libtpu: 0.0.40
codegen_flags: <defaults>
</compile_context>

<pallas_src>
import math

import jax
import jax.numpy as jnp
from jax.experimental import pallas as pl
from jax.experimental.pallas import tpu as pltpu

# ----------------------------- config -----------------------------
VOCAB = 100
MAX_POS = 16
HIDDEN = 128
N_HEADS = 4
HEAD_DIM = HIDDEN // N_HEADS
FFN = 256
N_LAYERS = 2
N_CLASSES = 3
CLS_PAD = 128          # classifier head padded to a full lane tile
LN_EPS = 1e-12         # DistilBERT LayerNorm eps

_VMEM = pl.BlockSpec(memory_space=pltpu.MemorySpace.VMEM)


# ----------------------------- fused kernel -----------------------------
def _fused_encoder_kernel(
    x_ref, bias_ref,
    emb_g_ref, emb_b_ref,
    wqkv_ref, bqkv_ref, wo_ref, bo_ref,
    ln1_g_ref, ln1_b_ref,
    wff1_ref, bff1_ref, wff2_ref, bff2_ref,
    ln2_g_ref, ln2_b_ref,
    wcls_ref, bcls_ref,
    out_ref,
):
    def ln(v, g, b):
        # f32 elementwise (v5e has no bf16 VPU/EUP).
        mean = jnp.mean(v, axis=-1, keepdims=True)
        var = jnp.mean(jnp.square(v - mean), axis=-1, keepdims=True)
        return (v - mean) * jax.lax.rsqrt(var + LN_EPS) * g + b

    def mm(a, w):
        # bf16 operands on the MXU, f32 accumulation.
        return jnp.dot(a.astype(jnp.bfloat16), w.astype(jnp.bfloat16),
                       preferred_element_type=jnp.float32)

    x = x_ref[...]                               # (BS, H) f32
    bias = bias_ref[...]                         # (BS, BS) f32 additive attention bias
    x = ln(x, emb_g_ref[...], emb_b_ref[...])    # embedding LayerNorm

    scale = jnp.float32(1.0 / math.sqrt(HEAD_DIM))
    n_layers = wqkv_ref.shape[0]

    for li in range(n_layers):                   # static unroll, all weights resident in VMEM
        # ---- self-attention: fused QKV matmul, all heads in one pass ----
        qkv = mm(x, wqkv_ref[li]) + bqkv_ref[li]          # (BS, 3H), layout [Q | K | V]
        q = qkv[:, 0 * HIDDEN:1 * HIDDEN]
        k = qkv[:, 1 * HIDDEN:2 * HIDDEN]
        v = qkv[:, 2 * HIDDEN:3 * HIDDEN]

        sa = jnp.zeros_like(x)                             # (BS, H) f32
        for h in range(N_HEADS):                           # static unroll
            lo = h * HEAD_DIM
            hi = lo + HEAD_DIM
            qh = q[:, lo:hi]
            kh = k[:, lo:hi]
            vh = v[:, lo:hi]
            # scores = qh @ kh^T without materializing a transpose.
            scores = jax.lax.dot_general(
                qh.astype(jnp.bfloat16), kh.astype(jnp.bfloat16),
                dimension_numbers=(((1,), (1,)), ((), ())),
                preferred_element_type=jnp.float32)
            scores = scores * scale + bias                 # f32 score/softmax path
            m = jnp.max(scores, axis=-1, keepdims=True)
            p = jnp.exp(scores - m)
            denom = jnp.sum(p, axis=-1, keepdims=True)
            probs = p * pl.reciprocal(denom, approx=True)  # EUP reciprocal
            ctx_h = mm(probs, vh)                          # (BS, D)
            # Merge heads by accumulating through the (sublane-sliced) output projection.
            sa = sa + mm(ctx_h, wo_ref[li, lo:hi, :])      # (BS, H)
        sa = sa + bo_ref[li]
        x = ln(sa + x, ln1_g_ref[li], ln1_b_ref[li])

        # ---- feed-forward ----
        h1 = mm(x, wff1_ref[li]) + bff1_ref[li]
        # TODO(synk): HF DistilBERT uses exact erf GELU; tanh approximation used here.
        h1 = jax.nn.gelu(h1)
        ff = mm(h1, wff2_ref[li]) + bff2_ref[li]
        x = ln(ff + x, ln2_g_ref[li], ln2_b_ref[li])

    # ---- padded classifier head: lane-dense (BS, 128) output ----
    out_ref[...] = mm(x, wcls_ref[...]) + bcls_ref[...]


# ----------------------------- params -----------------------------
def init_params(key):
    k_word, k_pos, k_layers, k_cls = jax.random.split(key, 4)

    def dense(k, fan_in, fan_out):
        return jax.random.normal(k, (fan_in, fan_out), jnp.float32) * 0.02

    wqkv, bqkv, wo, bo = [], [], [], []
    wff1, bff1, wff2, bff2 = [], [], [], []
    ln1_g, ln1_b, ln2_g, ln2_b = [], [], [], []
    layer_keys = jax.random.split(k_layers, N_LAYERS)
    for li in range(N_LAYERS):
        lk = jax.random.split(layer_keys[li], 6)
        wq = dense(lk[0], HIDDEN, HIDDEN)
        wk = dense(lk[1], HIDDEN, HIDDEN)
        wv = dense(lk[2], HIDDEN, HIDDEN)
        wqkv.append(jnp.concatenate([wq, wk, wv], axis=1))           # (H, 3H) = [Q | K | V]
        bqkv.append(jnp.zeros((1, 3 * HIDDEN), jnp.float32))
        wo.append(dense(lk[3], HIDDEN, HIDDEN))
        bo.append(jnp.zeros((1, HIDDEN), jnp.float32))
        wff1.append(dense(lk[4], HIDDEN, FFN))
        bff1.append(jnp.zeros((1, FFN), jnp.float32))
        wff2.append(dense(lk[5], FFN, HIDDEN))
        bff2.append(jnp.zeros((1, HIDDEN), jnp.float32))
        ln1_g.append(jnp.ones((1, HIDDEN), jnp.float32))
        ln1_b.append(jnp.zeros((1, HIDDEN), jnp.float32))
        ln2_g.append(jnp.ones((1, HIDDEN), jnp.float32))
        ln2_b.append(jnp.zeros((1, HIDDEN), jnp.float32))

    w_cls = dense(k_cls, HIDDEN, N_CLASSES)
    wcls_pad = jnp.zeros((HIDDEN, CLS_PAD), jnp.float32).at[:, :N_CLASSES].set(w_cls)
    bcls_pad = jnp.zeros((1, CLS_PAD), jnp.float32)

    return {
        "word_emb": jax.random.normal(k_word, (VOCAB, HIDDEN), jnp.float32) * 0.02,
        "pos_emb": jax.random.normal(k_pos, (MAX_POS, HIDDEN), jnp.float32) * 0.02,
        "emb_ln_g": jnp.ones((1, HIDDEN), jnp.float32),
        "emb_ln_b": jnp.zeros((1, HIDDEN), jnp.float32),
        # MXU weights stored in bf16 (cast at the dot; f32 accumulation, f32 elementwise).
        "wqkv": jnp.stack(wqkv).astype(jnp.bfloat16),
        "bqkv": jnp.stack(bqkv),
        "wo": jnp.stack(wo).astype(jnp.bfloat16),
        "bo": jnp.stack(bo),
        "ln1_g": jnp.stack(ln1_g), "ln1_b": jnp.stack(ln1_b),
        "wff1": jnp.stack(wff1).astype(jnp.bfloat16), "bff1": jnp.stack(bff1),
        "wff2": jnp.stack(wff2).astype(jnp.bfloat16), "bff2": jnp.stack(bff2),
        "ln2_g": jnp.stack(ln2_g), "ln2_b": jnp.stack(ln2_b),
        "wcls": wcls_pad.astype(jnp.bfloat16),
        "bcls": bcls_pad,
    }


# ----------------------------- model -----------------------------
def model_forward(params, input_ids, attention_mask):
    """Equivalent of ModelClass.forward (multiclass branch: raw logits)."""
    B, S = input_ids.shape

    # Embedding gather + positional add is JAX glue; everything else is one Pallas kernel.
    word = jnp.take(params["word_emb"], input_ids, axis=0)           # (B, S, H)
    pos = params["pos_emb"][:S][None, :, :]                          # (1, S, H)
    x = (word + pos).reshape(B * S, HIDDEN).astype(jnp.float32)

    # Block-diagonal additive attention bias: 0 where (same batch AND key not padded),
    # -1e30 otherwise. Lets the kernel treat attention as a single (B*S, B*S) problem.
    tok_batch = jnp.repeat(jnp.arange(B), S)                         # (BS,)
    same_batch = tok_batch[:, None] == tok_batch[None, :]
    key_valid = attention_mask.reshape(-1) > 0
    attn_bias = jnp.where(same_batch & key_valid[None, :],
                          0.0, -1e30).astype(jnp.float32)            # (BS, BS)

    out_padded = pl.pallas_call(
        _fused_encoder_kernel,
        out_shape=jax.ShapeDtypeStruct((B * S, CLS_PAD), jnp.float32),
        in_specs=[_VMEM] * 18,
        out_specs=_VMEM,
    )(
        x, attn_bias,
        params["emb_ln_g"], params["emb_ln_b"],
        params["wqkv"], params["bqkv"], params["wo"], params["bo"],
        params["ln1_g"], params["ln1_b"],
        params["wff1"], params["bff1"], params["wff2"], params["bff2"],
        params["ln2_g"], params["ln2_b"],
        params["wcls"], params["bcls"],
    )

    # [CLS] token (position 0 of each sequence), keep the real logit columns.
    logits = out_padded.reshape(B, S, CLS_PAD)[:, 0, :N_CLASSES]     # multiclass -> no sigmoid
    return logits


# ----------------------------- main -----------------------------
if __name__ == "__main__":
    key = jax.random.PRNGKey(0)
    pkey, ikey = jax.random.split(key)

    params = init_params(pkey)

    B, S = 2, 8
    input_ids = jax.random.randint(ikey, (B, S), 0, VOCAB, dtype=jnp.int32)
    attention_mask = jnp.array(
        [[1, 1, 1, 1, 1, 1, 1, 1],
         [1, 1, 1, 1, 1, 0, 0, 0]], dtype=jnp.int32)  # second sample has padding

    fwd = jax.jit(model_forward)
    logits = jax.block_until_ready(fwd(params, input_ids, attention_mask))

    assert logits.shape == (B, N_CLASSES)
    assert bool(jnp.all(jnp.isfinite(logits)))
    print("KERNEL_OK")
</pallas_src>

<mosaic_0001>
module attributes {stable_mosaic.version = 11 : i64} {
  func.func @_fused_encoder_kernel(%arg0: memref<16x128xf32, #tpu.memory_space<vmem>>, %arg1: memref<16x16xf32, #tpu.memory_space<vmem>>, %arg2: memref<1x128xf32, #tpu.memory_space<vmem>>, %arg3: memref<1x128xf32, #tpu.memory_space<vmem>>, %arg4: memref<2x128x384xbf16, #tpu.memory_space<vmem>>, %arg5: memref<2x1x384xf32, #tpu.memory_space<vmem>>, %arg6: memref<2x128x128xbf16, #tpu.memory_space<vmem>>, %arg7: memref<2x1x128xf32, #tpu.memory_space<vmem>>, %arg8: memref<2x1x128xf32, #tpu.memory_space<vmem>>, %arg9: memref<2x1x128xf32, #tpu.memory_space<vmem>>, %arg10: memref<2x128x256xbf16, #tpu.memory_space<vmem>>, %arg11: memref<2x1x256xf32, #tpu.memory_space<vmem>>, %arg12: memref<2x256x128xbf16, #tpu.memory_space<vmem>>, %arg13: memref<2x1x128xf32, #tpu.memory_space<vmem>>, %arg14: memref<2x1x128xf32, #tpu.memory_space<vmem>>, %arg15: memref<2x1x128xf32, #tpu.memory_space<vmem>>, %arg16: memref<128x128xbf16, #tpu.memory_space<vmem>>, %arg17: memref<1x128xf32, #tpu.memory_space<vmem>>, %arg18: memref<16x128xf32, #tpu.memory_space<vmem>>) attributes {dimension_semantics = [], scalar_prefetch = 0 : i64, scratch_operands = 0 : i64, tpu.core_type = #tpu.core_type<tc>} {
    %c0 = arith.constant 0 : index
    %c0_0 = arith.constant 0 : index
    %0 = vector.load %arg0[%c0, %c0_0] : memref<16x128xf32, #tpu.memory_space<vmem>>, vector<16x128xf32>
    %c0_1 = arith.constant 0 : index
    %c0_2 = arith.constant 0 : index
    %1 = vector.load %arg1[%c0_1, %c0_2] : memref<16x16xf32, #tpu.memory_space<vmem>>, vector<16x16xf32>
    %c0_3 = arith.constant 0 : index
    %c0_4 = arith.constant 0 : index
    %2 = vector.load %arg2[%c0_3, %c0_4] : memref<1x128xf32, #tpu.memory_space<vmem>>, vector<1x128xf32>
    %c0_5 = arith.constant 0 : index
    %c0_6 = arith.constant 0 : index
    %3 = vector.load %arg3[%c0_5, %c0_6] : memref<1x128xf32, #tpu.memory_space<vmem>>, vector<1x128xf32>
    %cst = arith.constant dense<0.000000e+00> : vector<16xf32>
    %4 = vector.multi_reduction <add>, %0, %cst [1] : vector<16x128xf32> to vector<16xf32>
    %5 = vector.shape_cast %4 : vector<16xf32> to vector<16x1xf32>
    %cst_7 = arith.constant 1.280000e+02 : f32
    %6 = vector.broadcast %cst_7 : f32 to vector<16x1xf32>
    %7 = arith.divf %5, %6 : vector<16x1xf32>
    %8 = vector.broadcast %7 : vector<16x1xf32> to vector<16x128xf32>
    %9 = arith.subf %0, %8 : vector<16x128xf32>
    %10 = arith.mulf %9, %9 : vector<16x128xf32>
    %cst_8 = arith.constant dense<0.000000e+00> : vector<16xf32>
    %11 = vector.multi_reduction <add>, %10, %cst_8 [1] : vector<16x128xf32> to vector<16xf32>
    %12 = vector.shape_cast %11 : vector<16xf32> to vector<16x1xf32>
    %cst_9 = arith.constant 1.280000e+02 : f32
    %13 = vector.broadcast %cst_9 : f32 to vector<16x1xf32>
    %14 = arith.divf %12, %13 : vector<16x1xf32>
    %15 = vector.broadcast %7 : vector<16x1xf32> to vector<16x128xf32>
    %16 = arith.subf %0, %15 : vector<16x128xf32>
    %cst_10 = arith.constant 9.99999996E-13 : f32
    %17 = vector.broadcast %cst_10 : f32 to vector<16x1xf32>
    %18 = arith.addf %14, %17 : vector<16x1xf32>
    %19 = math.rsqrt %18 : vector<16x1xf32>
    %20 = vector.broadcast %19 : vector<16x1xf32> to vector<16x128xf32>
    %21 = arith.mulf %16, %20 : vector<16x128xf32>
    %22 = vector.broadcast %2 : vector<1x128xf32> to vector<16x128xf32>
    %23 = arith.mulf %21, %22 : vector<16x128xf32>
    %24 = vector.broadcast %3 : vector<1x128xf32> to vector<16x128xf32>
    %25 = arith.addf %23, %24 : vector<16x128xf32>
    %c0_11 = arith.constant 0 : index
    %c0_12 = arith.constant 0 : index
    %c0_13 = arith.constant 0 : index
    %26 = vector.load %arg4[%c0_11, %c0_12, %c0_13] : memref<2x128x384xbf16, #tpu.memory_space<vmem>>, vector<1x128x384xbf16>
    %27 = vector.shape_cast %26 : vector<1x128x384xbf16> to vector<128x384xbf16>
    %28 = arith.truncf %25 : vector<16x128xf32> to vector<16x128xbf16>
    %cst_14 = arith.constant dense<0.000000e+00> : vector<16x384xf32>
    %29 = tpu.matmul %28, %27, %cst_14 {dimension_numbers = #tpu.dot_dimension_numbers<[1], [0], [0], [1], [0, 0, 1, 1], [], []>} : vector<16x128xbf16>, vector<128x384xbf16>, vector<16x384xf32> -> vector<16x384xf32>
    %c0_15 = arith.constant 0 : index
    %c0_16 = arith.constant 0 : index
    %c0_17 = arith.constant 0 : index
    %30 = vector.load %arg5[%c0_15, %c0_16, %c0_17] : memref<2x1x384xf32, #tpu.memory_space<vmem>>, vector<1x1x384xf32>
    %31 = vector.shape_cast %30 : vector<1x1x384xf32> to vector<1x384xf32>
    %32 = vector.broadcast %31 : vector<1x384xf32> to vector<16x384xf32>
    %33 = arith.addf %29, %32 : vector<16x384xf32>
    %34 = vector.extract_strided_slice %33 {offsets = [0, 0], sizes = [16, 128], strides = [1, 1]} : vector<16x384xf32> to vector<16x128xf32>
    %35 = vector.extract_strided_slice %33 {offsets = [0, 128], sizes = [16, 128], strides = [1, 1]} : vector<16x384xf32> to vector<16x128xf32>
    %36 = vector.extract_strided_slice %33 {offsets = [0, 256], sizes = [16, 128], strides = [1, 1]} : vector<16x384xf32> to vector<16x128xf32>
    %cst_18 = arith.constant 0.000000e+00 : f32
    %37 = vector.broadcast %cst_18 : f32 to vector<16x128xf32>
    %38 = vector.extract_strided_slice %34 {offsets = [0, 0], sizes = [16, 32], strides = [1, 1]} : vector<16x128xf32> to vector<16x32xf32>
    %39 = vector.extract_strided_slice %35 {offsets = [0, 0], sizes = [16, 32], strides = [1, 1]} : vector<16x128xf32> to vector<16x32xf32>
    %40 = vector.extract_strided_slice %36 {offsets = [0, 0], sizes = [16, 32], strides = [1, 1]} : vector<16x128xf32> to vector<16x32xf32>
    %41 = arith.truncf %38 : vector<16x32xf32> to vector<16x32xbf16>
    %42 = arith.truncf %39 : vector<16x32xf32> to vector<16x32xbf16>
    %cst_19 = arith.constant dense<0.000000e+00> : vector<16x16xf32>
    %43 = tpu.matmul %41, %42, %cst_19 {dimension_numbers = #tpu.dot_dimension_numbers<[1], [1], [0], [0], [0, 0, 1, 0], [], []>} : vector<16x32xbf16>, vector<16x32xbf16>, vector<16x16xf32> -> vector<16x16xf32>
    %cst_20 = arith.constant 0.176776692 : f32
    %44 = vector.broadcast %cst_20 : f32 to vector<16x16xf32>
    %45 = arith.mulf %43, %44 : vector<16x16xf32>
    %46 = arith.addf %45, %1 : vector<16x16xf32>
    %cst_21 = arith.constant dense<0xFF800000> : vector<16xf32>
    %47 = vector.multi_reduction <maximumf>, %46, %cst_21 [1] : vector<16x16xf32> to vector<16xf32>
    %48 = vector.shape_cast %47 : vector<16xf32> to vector<16x1xf32>
    %49 = vector.broadcast %48 : vector<16x1xf32> to vector<16x16xf32>
    %50 = arith.subf %46, %49 : vector<16x16xf32>
    %51 = math.exp %50 : vector<16x16xf32>
    %cst_22 = arith.constant dense<0.000000e+00> : vector<16xf32>
    %52 = vector.multi_reduction <add>, %51, %cst_22 [1] : vector<16x16xf32> to vector<16xf32>
    %53 = vector.shape_cast %52 : vector<16xf32> to vector<16x1xf32>
    %54 = tpu.reciprocal %53 {approx = true} : vector<16x1xf32> -> vector<16x1xf32>
    %55 = vector.broadcast %54 : vector<16x1xf32> to vector<16x16xf32>
    %56 = arith.mulf %51, %55 : vector<16x16xf32>
    %57 = arith.truncf %56 : vector<16x16xf32> to vector<16x16xbf16>
    %58 = arith.truncf %40 : vector<16x32xf32> to vector<16x32xbf16>
    %cst_23 = arith.constant dense<0.000000e+00> : vector<16x32xf32>
    %59 = tpu.matmul %57, %58, %cst_23 {dimension_numbers = #tpu.dot_dimension_numbers<[1], [0], [0], [1], [0, 0, 1, 1], [], []>} : vector<16x16xbf16>, vector<16x32xbf16>, vector<16x32xf32> -> vector<16x32xf32>
    %c0_24 = arith.constant 0 : index
    %c0_25 = arith.constant 0 : index
    %c0_26 = arith.constant 0 : index
    %60 = vector.load %arg6[%c0_24, %c0_25, %c0_26] : memref<2x128x128xbf16, #tpu.memory_space<vmem>>, vector<1x32x128xbf16>
    %61 = vector.shape_cast %60 : vector<1x32x128xbf16> to vector<32x128xbf16>
    %62 = arith.truncf %59 : vector<16x32xf32> to vector<16x32xbf16>
    %cst_27 = arith.constant dense<0.000000e+00> : vector<16x128xf32>
    %63 = tpu.matmul %62, %61, %cst_27 {dimension_numbers = #tpu.dot_dimension_numbers<[1], [0], [0], [1], [0, 0, 1, 1], [], []>} : vector<16x32xbf16>, vector<32x128xbf16>, vector<16x128xf32> -> vector<16x128xf32>
    %64 = arith.addf %37, %63 : vector<16x128xf32>
    %65 = vector.extract_strided_slice %34 {offsets = [0, 32], sizes = [16, 32], strides = [1, 1]} : vector<16x128xf32> to vector<16x32xf32>
    %66 = vector.extract_strided_slice %35 {offsets = [0, 32], sizes = [16, 32], strides = [1, 1]} : vector<16x128xf32> to vector<16x32xf32>
    %67 = vector.extract_strided_slice %36 {offsets = [0, 32], sizes = [16, 32], strides = [1, 1]} : vector<16x128xf32> to vector<16x32xf32>
    %68 = arith.truncf %65 : vector<16x32xf32> to vector<16x32xbf16>
    %69 = arith.truncf %66 : vector<16x32xf32> to vector<16x32xbf16>
    %cst_28 = arith.constant dense<0.000000e+00> : vector<16x16xf32>
    %70 = tpu.matmul %68, %69, %cst_28 {dimension_numbers = #tpu.dot_dimension_numbers<[1], [1], [0], [0], [0, 0, 1, 0], [], []>} : vector<16x32xbf16>, vector<16x32xbf16>, vector<16x16xf32> -> vector<16x16xf32>
    %cst_29 = arith.constant 0.176776692 : f32
    %71 = vector.broadcast %cst_29 : f32 to vector<16x16xf32>
    %72 = arith.mulf %70, %71 : vector<16x16xf32>
    %73 = arith.addf %72, %1 : vector<16x16xf32>
    %cst_30 = arith.constant dense<0xFF800000> : vector<16xf32>
    %74 = vector.multi_reduction <maximumf>, %73, %cst_30 [1] : vector<16x16xf32> to vector<16xf32>
    %75 = vector.shape_cast %74 : vector<16xf32> to vector<16x1xf32>
    %76 = vector.broadcast %75 : vector<16x1xf32> to vector<16x16xf32>
    %77 = arith.subf %73, %76 : vector<16x16xf32>
    %78 = math.exp %77 : vector<16x16xf32>
    %cst_31 = arith.constant dense<0.000000e+00> : vector<16xf32>
    %79 = vector.multi_reduction <add>, %78, %cst_31 [1] : vector<16x16xf32> to vector<16xf32>
    %80 = vector.shape_cast %79 : vector<16xf32> to vector<16x1xf32>
    %81 = tpu.reciprocal %80 {approx = true} : vector<16x1xf32> -> vector<16x1xf32>
    %82 = vector.broadcast %81 : vector<16x1xf32> to vector<16x16xf32>
    %83 = arith.mulf %78, %82 : vector<16x16xf32>
    %84 = arith.truncf %83 : vector<16x16xf32> to vector<16x16xbf16>
    %85 = arith.truncf %67 : vector<16x32xf32> to vector<16x32xbf16>
    %cst_32 = arith.constant dense<0.000000e+00> : vector<16x32xf32>
    %86 = tpu.matmul %84, %85, %cst_32 {dimension_numbers = #tpu.dot_dimension_numbers<[1], [0], [0], [1], [0, 0, 1, 1], [], []>} : vector<16x16xbf16>, vector<16x32xbf16>, vector<16x32xf32> -> vector<16x32xf32>
    %c0_33 = arith.constant 0 : index
    %c32 = arith.constant 32 : index
    %c0_34 = arith.constant 0 : index
    %87 = vector.load %arg6[%c0_33, %c32, %c0_34] : memref<2x128x128xbf16, #tpu.memory_space<vmem>>, vector<1x32x128xbf16>
    %88 = vector.shape_cast %87 : vector<1x32x128xbf16> to vector<32x128xbf16>
    %89 = arith.truncf %86 : vector<16x32xf32> to vector<16x32xbf16>
    %cst_35 = arith.constant dense<0.000000e+00> : vector<16x128xf32>
    %90 = tpu.matmul %89, %88, %cst_35 {dimension_numbers = #tpu.dot_dimension_numbers<[1], [0], [0], [1], [0, 0, 1, 1], [], []>} : vector<16x32xbf16>, vector<32x128xbf16>, vector<16x128xf32> -> vector<16x128xf32>
    %91 = arith.addf %64, %90 : vector<16x128xf32>
    %92 = vector.extract_strided_slice %34 {offsets = [0, 64], sizes = [16, 32], strides = [1, 1]} : vector<16x128xf32> to vector<16x32xf32>
    %93 = vector.extract_strided_slice %35 {offsets = [0, 64], sizes = [16, 32], strides = [1, 1]} : vector<16x128xf32> to vector<16x32xf32>
    %94 = vector.extract_strided_slice %36 {offsets = [0, 64], sizes = [16, 32], strides = [1, 1]} : vector<16x128xf32> to vector<16x32xf32>
    %95 = arith.truncf %92 : vector<16x32xf32> to vector<16x32xbf16>
    %96 = arith.truncf %93 : vector<16x32xf32> to vector<16x32xbf16>
    %cst_36 = arith.constant dense<0.000000e+00> : vector<16x16xf32>
    %97 = tpu.matmul %95, %96, %cst_36 {dimension_numbers = #tpu.dot_dimension_numbers<[1], [1], [0], [0], [0, 0, 1, 0], [], []>} : vector<16x32xbf16>, vector<16x32xbf16>, vector<16x16xf32> -> vector<16x16xf32>
    %cst_37 = arith.constant 0.176776692 : f32
    %98 = vector.broadcast %cst_37 : f32 to vector<16x16xf32>
    %99 = arith.mulf %97, %98 : vector<16x16xf32>
    %100 = arith.addf %99, %1 : vector<16x16xf32>
    %cst_38 = arith.constant dense<0xFF800000> : vector<16xf32>
    %101 = vector.multi_reduction <maximumf>, %100, %cst_38 [1] : vector<16x16xf32> to vector<16xf32>
    %102 = vector.shape_cast %101 : vector<16xf32> to vector<16x1xf32>
    %103 = vector.broadcast %102 : vector<16x1xf32> to vector<16x16xf32>
    %104 = arith.subf %100, %103 : vector<16x16xf32>
    %105 = math.exp %104 : vector<16x16xf32>
    %cst_39 = arith.constant dense<0.000000e+00> : vector<16xf32>
    %106 = vector.multi_reduction <add>, %105, %cst_39 [1] : vector<16x16xf32> to vector<16xf32>
    %107 = vector.shape_cast %106 : vector<16xf32> to vector<16x1xf32>
    %108 = tpu.reciprocal %107 {approx = true} : vector<16x1xf32> -> vector<16x1xf32>
    %109 = vector.broadcast %108 : vector<16x1xf32> to vector<16x16xf32>
    %110 = arith.mulf %105, %109 : vector<16x16xf32>
    %111 = arith.truncf %110 : vector<16x16xf32> to vector<16x16xbf16>
    %112 = arith.truncf %94 : vector<16x32xf32> to vector<16x32xbf16>
    %cst_40 = arith.constant dense<0.000000e+00> : vector<16x32xf32>
    %113 = tpu.matmul %111, %112, %cst_40 {dimension_numbers = #tpu.dot_dimension_numbers<[1], [0], [0], [1], [0, 0, 1, 1], [], []>} : vector<16x16xbf16>, vector<16x32xbf16>, vector<16x32xf32> -> vector<16x32xf32>
    %c0_41 = arith.constant 0 : index
    %c64 = arith.constant 64 : index
    %c0_42 = arith.constant 0 : index
    %114 = vector.load %arg6[%c0_41, %c64, %c0_42] : memref<2x128x128xbf16, #tpu.memory_space<vmem>>, vector<1x32x128xbf16>
    %115 = vector.shape_cast %114 : vector<1x32x128xbf16> to vector<32x128xbf16>
    %116 = arith.truncf %113 : vector<16x32xf32> to vector<16x32xbf16>
    %cst_43 = arith.constant dense<0.000000e+00> : vector<16x128xf32>
    %117 = tpu.matmul %116, %115, %cst_43 {dimension_numbers = #tpu.dot_dimension_numbers<[1], [0], [0], [1], [0, 0, 1, 1], [], []>} : vector<16x32xbf16>, vector<32x128xbf16>, vector<16x128xf32> -> vector<16x128xf32>
    %118 = arith.addf %91, %117 : vector<16x128xf32>
    %119 = vector.extract_strided_slice %34 {offsets = [0, 96], sizes = [16, 32], strides = [1, 1]} : vector<16x128xf32> to vector<16x32xf32>
    %120 = vector.extract_strided_slice %35 {offsets = [0, 96], sizes = [16, 32], strides = [1, 1]} : vector<16x128xf32> to vector<16x32xf32>
    %121 = vector.extract_strided_slice %36 {offsets = [0, 96], sizes = [16, 32], strides = [1, 1]} : vector<16x128xf32> to vector<16x32xf32>
    %122 = arith.truncf %119 : vector<16x32xf32> to vector<16x32xbf16>
    %123 = arith.truncf %120 : vector<16x32xf32> to vector<16x32xbf16>
    %cst_44 = arith.constant dense<0.000000e+00> : vector<16x16xf32>
    %124 = tpu.matmul %122, %123, %cst_44 {dimension_numbers = #tpu.dot_dimension_numbers<[1], [1], [0], [0], [0, 0, 1, 0], [], []>} : vector<16x32xbf16>, vector<16x32xbf16>, vector<16x16xf32> -> vector<16x16xf32>
    %cst_45 = arith.constant 0.176776692 : f32
    %125 = vector.broadcast %cst_45 : f32 to vector<16x16xf32>
    %126 = arith.mulf %124, %125 : vector<16x16xf32>
    %127 = arith.addf %126, %1 : vector<16x16xf32>
    %cst_46 = arith.constant dense<0xFF800000> : vector<16xf32>
    %128 = vector.multi_reduction <maximumf>, %127, %cst_46 [1] : vector<16x16xf32> to vector<16xf32>
    %129 = vector.shape_cast %128 : vector<16xf32> to vector<16x1xf32>
    %130 = vector.broadcast %129 : vector<16x1xf32> to vector<16x16xf32>
    %131 = arith.subf %127, %130 : vector<16x16xf32>
    %132 = math.exp %131 : vector<16x16xf32>
    %cst_47 = arith.constant dense<0.000000e+00> : vector<16xf32>
    %133 = vector.multi_reduction <add>, %132, %cst_47 [1] : vector<16x16xf32> to vector<16xf32>
    %134 = vector.shape_cast %133 : vector<16xf32> to vector<16x1xf32>
    %135 = tpu.reciprocal %134 {approx = true} : vector<16x1xf32> -> vector<16x1xf32>
    %136 = vector.broadcast %135 : vector<16x1xf32> to vector<16x16xf32>
    %137 = arith.mulf %132, %136 : vector<16x16xf32>
    %138 = arith.truncf %137 : vector<16x16xf32> to vector<16x16xbf16>
    %139 = arith.truncf %121 : vector<16x32xf32> to vector<16x32xbf16>
    %cst_48 = arith.constant dense<0.000000e+00> : vector<16x32xf32>
    %140 = tpu.matmul %138, %139, %cst_48 {dimension_numbers = #tpu.dot_dimension_numbers<[1], [0], [0], [1], [0, 0, 1, 1], [], []>} : vector<16x16xbf16>, vector<16x32xbf16>, vector<16x32xf32> -> vector<16x32xf32>
    %c0_49 = arith.constant 0 : index
    %c96 = arith.constant 96 : index
    %c0_50 = arith.constant 0 : index
    %141 = vector.load %arg6[%c0_49, %c96, %c0_50] : memref<2x128x128xbf16, #tpu.memory_space<vmem>>, vector<1x32x128xbf16>
    %142 = vector.shape_cast %141 : vector<1x32x128xbf16> to vector<32x128xbf16>
    %143 = arith.truncf %140 : vector<16x32xf32> to vector<16x32xbf16>
    %cst_51 = arith.constant dense<0.000000e+00> : vector<16x128xf32>
    %144 = tpu.matmul %143, %142, %cst_51 {dimension_numbers = #tpu.dot_dimension_numbers<[1], [0], [0], [1], [0, 0, 1, 1], [], []>} : vector<16x32xbf16>, vector<32x128xbf16>, vector<16x128xf32> -> vector<16x128xf32>
    %145 = arith.addf %118, %144 : vector<16x128xf32>
    %c0_52 = arith.constant 0 : index
    %c0_53 = arith.constant 0 : index
    %c0_54 = arith.constant 0 : index
    %146 = vector.load %arg7[%c0_52, %c0_53, %c0_54] : memref<2x1x128xf32, #tpu.memory_space<vmem>>, vector<1x1x128xf32>
    %147 = vector.shape_cast %146 : vector<1x1x128xf32> to vector<1x128xf32>
    %148 = vector.broadcast %147 : vector<1x128xf32> to vector<16x128xf32>
    %149 = arith.addf %145, %148 : vector<16x128xf32>
    %150 = arith.addf %149, %25 : vector<16x128xf32>
    %c0_55 = arith.constant 0 : index
    %c0_56 = arith.constant 0 : index
    %c0_57 = arith.constant 0 : index
    %151 = vector.load %arg8[%c0_55, %c0_56, %c0_57] : memref<2x1x128xf32, #tpu.memory_space<vmem>>, vector<1x1x128xf32>
    %152 = vector.shape_cast %151 : vector<1x1x128xf32> to vector<1x128xf32>
    %c0_58 = arith.constant 0 : index
    %c0_59 = arith.constant 0 : index
    %c0_60 = arith.constant 0 : index
    %153 = vector.load %arg9[%c0_58, %c0_59, %c0_60] : memref<2x1x128xf32, #tpu.memory_space<vmem>>, vector<1x1x128xf32>
    %154 = vector.shape_cast %153 : vector<1x1x128xf32> to vector<1x128xf32>
    %cst_61 = arith.constant dense<0.000000e+00> : vector<16xf32>
    %155 = vector.multi_reduction <add>, %150, %cst_61 [1] : vector<16x128xf32> to vector<16xf32>
    %156 = vector.shape_cast %155 : vector<16xf32> to vector<16x1xf32>
    %cst_62 = arith.constant 1.280000e+02 : f32
    %157 = vector.broadcast %cst_62 : f32 to vector<16x1xf32>
    %158 = arith.divf %156, %157 : vector<16x1xf32>
    %159 = vector.broadcast %158 : vector<16x1xf32> to vector<16x128xf32>
    %160 = arith.subf %150, %159 : vector<16x128xf32>
    %161 = arith.mulf %160, %160 : vector<16x128xf32>
    %cst_63 = arith.constant dense<0.000000e+00> : vector<16xf32>
    %162 = vector.multi_reduction <add>, %161, %cst_63 [1] : vector<16x128xf32> to vector<16xf32>
    %163 = vector.shape_cast %162 : vector<16xf32> to vector<16x1xf32>
    %cst_64 = arith.constant 1.280000e+02 : f32
    %164 = vector.broadcast %cst_64 : f32 to vector<16x1xf32>
    %165 = arith.divf %163, %164 : vector<16x1xf32>
    %166 = vector.broadcast %158 : vector<16x1xf32> to vector<16x128xf32>
    %167 = arith.subf %150, %166 : vector<16x128xf32>
    %cst_65 = arith.constant 9.99999996E-13 : f32
    %168 = vector.broadcast %cst_65 : f32 to vector<16x1xf32>
    %169 = arith.addf %165, %168 : vector<16x1xf32>
    %170 = math.rsqrt %169 : vector<16x1xf32>
    %171 = vector.broadcast %170 : vector<16x1xf32> to vector<16x128xf32>
    %172 = arith.mulf %167, %171 : vector<16x128xf32>
    %173 = vector.broadcast %152 : vector<1x128xf32> to vector<16x128xf32>
    %174 = arith.mulf %172, %173 : vector<16x128xf32>
    %175 = vector.broadcast %154 : vector<1x128xf32> to vector<16x128xf32>
    %176 = arith.addf %174, %175 : vector<16x128xf32>
    %c0_66 = arith.constant 0 : index
    %c0_67 = arith.constant 0 : index
    %c0_68 = arith.constant 0 : index
    %177 = vector.load %arg10[%c0_66, %c0_67, %c0_68] : memref<2x128x256xbf16, #tpu.memory_space<vmem>>, vector<1x128x256xbf16>
    %178 = vector.shape_cast %177 : vector<1x128x256xbf16> to vector<128x256xbf16>
    %179 = arith.truncf %176 : vector<16x128xf32> to vector<16x128xbf16>
    %cst_69 = arith.constant dense<0.000000e+00> : vector<16x256xf32>
    %180 = tpu.matmul %179, %178, %cst_69 {dimension_numbers = #tpu.dot_dimension_numbers<[1], [0], [0], [1], [0, 0, 1, 1], [], []>} : vector<16x128xbf16>, vector<128x256xbf16>, vector<16x256xf32> -> vector<16x256xf32>
    %c0_70 = arith.constant 0 : index
    %c0_71 = arith.constant 0 : index
    %c0_72 = arith.constant 0 : index
    %181 = vector.load %arg11[%c0_70, %c0_71, %c0_72] : memref<2x1x256xf32, #tpu.memory_space<vmem>>, vector<1x1x256xf32>
    %182 = vector.shape_cast %181 : vector<1x1x256xf32> to vector<1x256xf32>
    %183 = vector.broadcast %182 : vector<1x256xf32> to vector<16x256xf32>
    %184 = arith.addf %180, %183 : vector<16x256xf32>
    %185 = arith.mulf %184, %184 : vector<16x256xf32>
    %186 = arith.mulf %184, %185 : vector<16x256xf32>
    %cst_73 = arith.constant 4.471500e-02 : f32
    %187 = vector.broadcast %cst_73 : f32 to vector<16x256xf32>
    %188 = arith.mulf %187, %186 : vector<16x256xf32>
    %189 = arith.addf %184, %188 : vector<16x256xf32>
    %cst_74 = arith.constant 0.797884583 : f32
    %190 = vector.broadcast %cst_74 : f32 to vector<16x256xf32>
    %191 = arith.mulf %190, %189 : vector<16x256xf32>
    %192 = math.tanh %191 : vector<16x256xf32>
    %cst_75 = arith.constant 1.000000e+00 : f32
    %193 = vector.broadcast %cst_75 : f32 to vector<16x256xf32>
    %194 = arith.addf %193, %192 : vector<16x256xf32>
    %cst_76 = arith.constant 5.000000e-01 : f32
    %195 = vector.broadcast %cst_76 : f32 to vector<16x256xf32>
    %196 = arith.mulf %195, %194 : vector<16x256xf32>
    %197 = arith.mulf %184, %196 : vector<16x256xf32>
    %c0_77 = arith.constant 0 : index
    %c0_78 = arith.constant 0 : index
    %c0_79 = arith.constant 0 : index
    %198 = vector.load %arg12[%c0_77, %c0_78, %c0_79] : memref<2x256x128xbf16, #tpu.memory_space<vmem>>, vector<1x256x128xbf16>
    %199 = vector.shape_cast %198 : vector<1x256x128xbf16> to vector<256x128xbf16>
    %200 = arith.truncf %197 : vector<16x256xf32> to vector<16x256xbf16>
    %cst_80 = arith.constant dense<0.000000e+00> : vector<16x128xf32>
    %201 = tpu.matmul %200, %199, %cst_80 {dimension_numbers = #tpu.dot_dimension_numbers<[1], [0], [0], [1], [0, 0, 1, 1], [], []>} : vector<16x256xbf16>, vector<256x128xbf16>, vector<16x128xf32> -> vector<16x128xf32>
    %c0_81 = arith.constant 0 : index
    %c0_82 = arith.constant 0 : index
    %c0_83 = arith.constant 0 : index
    %202 = vector.load %arg13[%c0_81, %c0_82, %c0_83] : memref<2x1x128xf32, #tpu.memory_space<vmem>>, vector<1x1x128xf32>
    %203 = vector.shape_cast %202 : vector<1x1x128xf32> to vector<1x128xf32>
    %204 = vector.broadcast %203 : vector<1x128xf32> to vector<16x128xf32>
    %205 = arith.addf %201, %204 : vector<16x128xf32>
    %206 = arith.addf %205, %176 : vector<16x128xf32>
    %c0_84 = arith.constant 0 : index
    %c0_85 = arith.constant 0 : index
    %c0_86 = arith.constant 0 : index
    %207 = vector.load %arg14[%c0_84, %c0_85, %c0_86] : memref<2x1x128xf32, #tpu.memory_space<vmem>>, vector<1x1x128xf32>
    %208 = vector.shape_cast %207 : vector<1x1x128xf32> to vector<1x128xf32>
    %c0_87 = arith.constant 0 : index
    %c0_88 = arith.constant 0 : index
    %c0_89 = arith.constant 0 : index
    %209 = vector.load %arg15[%c0_87, %c0_88, %c0_89] : memref<2x1x128xf32, #tpu.memory_space<vmem>>, vector<1x1x128xf32>
    %210 = vector.shape_cast %209 : vector<1x1x128xf32> to vector<1x128xf32>
    %cst_90 = arith.constant dense<0.000000e+00> : vector<16xf32>
    %211 = vector.multi_reduction <add>, %206, %cst_90 [1] : vector<16x128xf32> to vector<16xf32>
    %212 = vector.shape_cast %211 : vector<16xf32> to vector<16x1xf32>
    %cst_91 = arith.constant 1.280000e+02 : f32
    %213 = vector.broadcast %cst_91 : f32 to vector<16x1xf32>
    %214 = arith.divf %212, %213 : vector<16x1xf32>
    %215 = vector.broadcast %214 : vector<16x1xf32> to vector<16x128xf32>
    %216 = arith.subf %206, %215 : vector<16x128xf32>
    %217 = arith.mulf %216, %216 : vector<16x128xf32>
    %cst_92 = arith.constant dense<0.000000e+00> : vector<16xf32>
    %218 = vector.multi_reduction <add>, %217, %cst_92 [1] : vector<16x128xf32> to vector<16xf32>
    %219 = vector.shape_cast %218 : vector<16xf32> to vector<16x1xf32>
    %cst_93 = arith.constant 1.280000e+02 : f32
    %220 = vector.broadcast %cst_93 : f32 to vector<16x1xf32>
    %221 = arith.divf %219, %220 : vector<16x1xf32>
    %222 = vector.broadcast %214 : vector<16x1xf32> to vector<16x128xf32>
    %223 = arith.subf %206, %222 : vector<16x128xf32>
    %cst_94 = arith.constant 9.99999996E-13 : f32
    %224 = vector.broadcast %cst_94 : f32 to vector<16x1xf32>
    %225 = arith.addf %221, %224 : vector<16x1xf32>
    %226 = math.rsqrt %225 : vector<16x1xf32>
    %227 = vector.broadcast %226 : vector<16x1xf32> to vector<16x128xf32>
    %228 = arith.mulf %223, %227 : vector<16x128xf32>
    %229 = vector.broadcast %208 : vector<1x128xf32> to vector<16x128xf32>
    %230 = arith.mulf %228, %229 : vector<16x128xf32>
    %231 = vector.broadcast %210 : vector<1x128xf32> to vector<16x128xf32>
    %232 = arith.addf %230, %231 : vector<16x128xf32>
    %c1 = arith.constant 1 : index
    %c0_95 = arith.constant 0 : index
    %c0_96 = arith.constant 0 : index
    %233 = vector.load %arg4[%c1, %c0_95, %c0_96] : memref<2x128x384xbf16, #tpu.memory_space<vmem>>, vector<1x128x384xbf16>
    %234 = vector.shape_cast %233 : vector<1x128x384xbf16> to vector<128x384xbf16>
    %235 = arith.truncf %232 : vector<16x128xf32> to vector<16x128xbf16>
    %cst_97 = arith.constant dense<0.000000e+00> : vector<16x384xf32>
    %236 = tpu.matmul %235, %234, %cst_97 {dimension_numbers = #tpu.dot_dimension_numbers<[1], [0], [0], [1], [0, 0, 1, 1], [], []>} : vector<16x128xbf16>, vector<128x384xbf16>, vector<16x384xf32> -> vector<16x384xf32>
    %c1_98 = arith.constant 1 : index
    %c0_99 = arith.constant 0 : index
    %c0_100 = arith.constant 0 : index
    %237 = vector.load %arg5[%c1_98, %c0_99, %c0_100] : memref<2x1x384xf32, #tpu.memory_space<vmem>>, vector<1x1x384xf32>
    %238 = vector.shape_cast %237 : vector<1x1x384xf32> to vector<1x384xf32>
    %239 = vector.broadcast %238 : vector<1x384xf32> to vector<16x384xf32>
    %240 = arith.addf %236, %239 : vector<16x384xf32>
    %241 = vector.extract_strided_slice %240 {offsets = [0, 0], sizes = [16, 128], strides = [1, 1]} : vector<16x384xf32> to vector<16x128xf32>
    %242 = vector.extract_strided_slice %240 {offsets = [0, 128], sizes = [16, 128], strides = [1, 1]} : vector<16x384xf32> to vector<16x128xf32>
    %243 = vector.extract_strided_slice %240 {offsets = [0, 256], sizes = [16, 128], strides = [1, 1]} : vector<16x384xf32> to vector<16x128xf32>
    %cst_101 = arith.constant 0.000000e+00 : f32
    %244 = vector.broadcast %cst_101 : f32 to vector<16x128xf32>
    %245 = vector.extract_strided_slice %241 {offsets = [0, 0], sizes = [16, 32], strides = [1, 1]} : vector<16x128xf32> to vector<16x32xf32>
    %246 = vector.extract_strided_slice %242 {offsets = [0, 0], sizes = [16, 32], strides = [1, 1]} : vector<16x128xf32> to vector<16x32xf32>
    %247 = vector.extract_strided_slice %243 {offsets = [0, 0], sizes = [16, 32], strides = [1, 1]} : vector<16x128xf32> to vector<16x32xf32>
    %248 = arith.truncf %245 : vector<16x32xf32> to vector<16x32xbf16>
    %249 = arith.truncf %246 : vector<16x32xf32> to vector<16x32xbf16>
    %cst_102 = arith.constant dense<0.000000e+00> : vector<16x16xf32>
    %250 = tpu.matmul %248, %249, %cst_102 {dimension_numbers = #tpu.dot_dimension_numbers<[1], [1], [0], [0], [0, 0, 1, 0], [], []>} : vector<16x32xbf16>, vector<16x32xbf16>, vector<16x16xf32> -> vector<16x16xf32>
    %cst_103 = arith.constant 0.176776692 : f32
    %251 = vector.broadcast %cst_103 : f32 to vector<16x16xf32>
    %252 = arith.mulf %250, %251 : vector<16x16xf32>
    %253 = arith.addf %252, %1 : vector<16x16xf32>
    %cst_104 = arith.constant dense<0xFF800000> : vector<16xf32>
    %254 = vector.multi_reduction <maximumf>, %253, %cst_104 [1] : vector<16x16xf32> to vector<16xf32>
    %255 = vector.shape_cast %254 : vector<16xf32> to vector<16x1xf32>
    %256 = vector.broadcast %255 : vector<16x1xf32> to vector<16x16xf32>
    %257 = arith.subf %253, %256 : vector<16x16xf32>
    %258 = math.exp %257 : vector<16x16xf32>
    %cst_105 = arith.constant dense<0.000000e+00> : vector<16xf32>
    %259 = vector.multi_reduction <add>, %258, %cst_105 [1] : vector<16x16xf32> to vector<16xf32>
    %260 = vector.shape_cast %259 : vector<16xf32> to vector<16x1xf32>
    %261 = tpu.reciprocal %260 {approx = true} : vector<16x1xf32> -> vector<16x1xf32>
    %262 = vector.broadcast %261 : vector<16x1xf32> to vector<16x16xf32>
    %263 = arith.mulf %258, %262 : vector<16x16xf32>
    %264 = arith.truncf %263 : vector<16x16xf32> to vector<16x16xbf16>
    %265 = arith.truncf %247 : vector<16x32xf32> to vector<16x32xbf16>
    %cst_106 = arith.constant dense<0.000000e+00> : vector<16x32xf32>
    %266 = tpu.matmul %264, %265, %cst_106 {dimension_numbers = #tpu.dot_dimension_numbers<[1], [0], [0], [1], [0, 0, 1, 1], [], []>} : vector<16x16xbf16>, vector<16x32xbf16>, vector<16x32xf32> -> vector<16x32xf32>
    %c1_107 = arith.constant 1 : index
    %c0_108 = arith.constant 0 : index
    %c0_109 = arith.constant 0 : index
    %267 = vector.load %arg6[%c1_107, %c0_108, %c0_109] : memref<2x128x128xbf16, #tpu.memory_space<vmem>>, vector<1x32x128xbf16>
    %268 = vector.shape_cast %267 : vector<1x32x128xbf16> to vector<32x128xbf16>
    %269 = arith.truncf %266 : vector<16x32xf32> to vector<16x32xbf16>
    %cst_110 = arith.constant dense<0.000000e+00> : vector<16x128xf32>
    %270 = tpu.matmul %269, %268, %cst_110 {dimension_numbers = #tpu.dot_dimension_numbers<[1], [0], [0], [1], [0, 0, 1, 1], [], []>} : vector<16x32xbf16>, vector<32x128xbf16>, vector<16x128xf32> -> vector<16x128xf32>
    %271 = arith.addf %244, %270 : vector<16x128xf32>
    %272 = vector.extract_strided_slice %241 {offsets = [0, 32], sizes = [16, 32], strides = [1, 1]} : vector<16x128xf32> to vector<16x32xf32>
    %273 = vector.extract_strided_slice %242 {offsets = [0, 32], sizes = [16, 32], strides = [1, 1]} : vector<16x128xf32> to vector<16x32xf32>
    %274 = vector.extract_strided_slice %243 {offsets = [0, 32], sizes = [16, 32], strides = [1, 1]} : vector<16x128xf32> to vector<16x32xf32>
    %275 = arith.truncf %272 : vector<16x32xf32> to vector<16x32xbf16>
    %276 = arith.truncf %273 : vector<16x32xf32> to vector<16x32xbf16>
    %cst_111 = arith.constant dense<0.000000e+00> : vector<16x16xf32>
    %277 = tpu.matmul %275, %276, %cst_111 {dimension_numbers = #tpu.dot_dimension_numbers<[1], [1], [0], [0], [0, 0, 1, 0], [], []>} : vector<16x32xbf16>, vector<16x32xbf16>, vector<16x16xf32> -> vector<16x16xf32>
    %cst_112 = arith.constant 0.176776692 : f32
    %278 = vector.broadcast %cst_112 : f32 to vector<16x16xf32>
    %279 = arith.mulf %277, %278 : vector<16x16xf32>
    %280 = arith.addf %279, %1 : vector<16x16xf32>
    %cst_113 = arith.constant dense<0xFF800000> : vector<16xf32>
    %281 = vector.multi_reduction <maximumf>, %280, %cst_113 [1] : vector<16x16xf32> to vector<16xf32>
    %282 = vector.shape_cast %281 : vector<16xf32> to vector<16x1xf32>
    %283 = vector.broadcast %282 : vector<16x1xf32> to vector<16x16xf32>
    %284 = arith.subf %280, %283 : vector<16x16xf32>
    %285 = math.exp %284 : vector<16x16xf32>
    %cst_114 = arith.constant dense<0.000000e+00> : vector<16xf32>
    %286 = vector.multi_reduction <add>, %285, %cst_114 [1] : vector<16x16xf32> to vector<16xf32>
    %287 = vector.shape_cast %286 : vector<16xf32> to vector<16x1xf32>
    %288 = tpu.reciprocal %287 {approx = true} : vector<16x1xf32> -> vector<16x1xf32>
    %289 = vector.broadcast %288 : vector<16x1xf32> to vector<16x16xf32>
    %290 = arith.mulf %285, %289 : vector<16x16xf32>
    %291 = arith.truncf %290 : vector<16x16xf32> to vector<16x16xbf16>
    %292 = arith.truncf %274 : vector<16x32xf32> to vector<16x32xbf16>
    %cst_115 = arith.constant dense<0.000000e+00> : vector<16x32xf32>
    %293 = tpu.matmul %291, %292, %cst_115 {dimension_numbers = #tpu.dot_dimension_numbers<[1], [0], [0], [1], [0, 0, 1, 1], [], []>} : vector<16x16xbf16>, vector<16x32xbf16>, vector<16x32xf32> -> vector<16x32xf32>
    %c1_116 = arith.constant 1 : index
    %c32_117 = arith.constant 32 : index
    %c0_118 = arith.constant 0 : index
    %294 = vector.load %arg6[%c1_116, %c32_117, %c0_118] : memref<2x128x128xbf16, #tpu.memory_space<vmem>>, vector<1x32x128xbf16>
    %295 = vector.shape_cast %294 : vector<1x32x128xbf16> to vector<32x128xbf16>
    %296 = arith.truncf %293 : vector<16x32xf32> to vector<16x32xbf16>
    %cst_119 = arith.constant dense<0.000000e+00> : vector<16x128xf32>
    %297 = tpu.matmul %296, %295, %cst_119 {dimension_numbers = #tpu.dot_dimension_numbers<[1], [0], [0], [1], [0, 0, 1, 1], [], []>} : vector<16x32xbf16>, vector<32x128xbf16>, vector<16x128xf32> -> vector<16x128xf32>
    %298 = arith.addf %271, %297 : vector<16x128xf32>
    %299 = vector.extract_strided_slice %241 {offsets = [0, 64], sizes = [16, 32], strides = [1, 1]} : vector<16x128xf32> to vector<16x32xf32>
    %300 = vector.extract_strided_slice %242 {offsets = [0, 64], sizes = [16, 32], strides = [1, 1]} : vector<16x128xf32> to vector<16x32xf32>
    %301 = vector.extract_strided_slice %243 {offsets = [0, 64], sizes = [16, 32], strides = [1, 1]} : vector<16x128xf32> to vector<16x32xf32>
    %302 = arith.truncf %299 : vector<16x32xf32> to vector<16x32xbf16>
    %303 = arith.truncf %300 : vector<16x32xf32> to vector<16x32xbf16>
    %cst_120 = arith.constant dense<0.000000e+00> : vector<16x16xf32>
    %304 = tpu.matmul %302, %303, %cst_120 {dimension_numbers = #tpu.dot_dimension_numbers<[1], [1], [0], [0], [0, 0, 1, 0], [], []>} : vector<16x32xbf16>, vector<16x32xbf16>, vector<16x16xf32> -> vector<16x16xf32>
    %cst_121 = arith.constant 0.176776692 : f32
    %305 = vector.broadcast %cst_121 : f32 to vector<16x16xf32>
    %306 = arith.mulf %304, %305 : vector<16x16xf32>
    %307 = arith.addf %306, %1 : vector<16x16xf32>
    %cst_122 = arith.constant dense<0xFF800000> : vector<16xf32>
    %308 = vector.multi_reduction <maximumf>, %307, %cst_122 [1] : vector<16x16xf32> to vector<16xf32>
    %309 = vector.shape_cast %308 : vector<16xf32> to vector<16x1xf32>
    %310 = vector.broadcast %309 : vector<16x1xf32> to vector<16x16xf32>
    %311 = arith.subf %307, %310 : vector<16x16xf32>
    %312 = math.exp %311 : vector<16x16xf32>
    %cst_123 = arith.constant dense<0.000000e+00> : vector<16xf32>
    %313 = vector.multi_reduction <add>, %312, %cst_123 [1] : vector<16x16xf32> to vector<16xf32>
    %314 = vector.shape_cast %313 : vector<16xf32> to vector<16x1xf32>
    %315 = tpu.reciprocal %314 {approx = true} : vector<16x1xf32> -> vector<16x1xf32>
    %316 = vector.broadcast %315 : vector<16x1xf32> to vector<16x16xf32>
    %317 = arith.mulf %312, %316 : vector<16x16xf32>
    %318 = arith.truncf %317 : vector<16x16xf32> to vector<16x16xbf16>
    %319 = arith.truncf %301 : vector<16x32xf32> to vector<16x32xbf16>
    %cst_124 = arith.constant dense<0.000000e+00> : vector<16x32xf32>
    %320 = tpu.matmul %318, %319, %cst_124 {dimension_numbers = #tpu.dot_dimension_numbers<[1], [0], [0], [1], [0, 0, 1, 1], [], []>} : vector<16x16xbf16>, vector<16x32xbf16>, vector<16x32xf32> -> vector<16x32xf32>
    %c1_125 = arith.constant 1 : index
    %c64_126 = arith.constant 64 : index
    %c0_127 = arith.constant 0 : index
    %321 = vector.load %arg6[%c1_125, %c64_126, %c0_127] : memref<2x128x128xbf16, #tpu.memory_space<vmem>>, vector<1x32x128xbf16>
    %322 = vector.shape_cast %321 : vector<1x32x128xbf16> to vector<32x128xbf16>
    %323 = arith.truncf %320 : vector<16x32xf32> to vector<16x32xbf16>
    %cst_128 = arith.constant dense<0.000000e+00> : vector<16x128xf32>
    %324 = tpu.matmul %323, %322, %cst_128 {dimension_numbers = #tpu.dot_dimension_numbers<[1], [0], [0], [1], [0, 0, 1, 1], [], []>} : vector<16x32xbf16>, vector<32x128xbf16>, vector<16x128xf32> -> vector<16x128xf32>
    %325 = arith.addf %298, %324 : vector<16x128xf32>
    %326 = vector.extract_strided_slice %241 {offsets = [0, 96], sizes = [16, 32], strides = [1, 1]} : vector<16x128xf32> to vector<16x32xf32>
    %327 = vector.extract_strided_slice %242 {offsets = [0, 96], sizes = [16, 32], strides = [1, 1]} : vector<16x128xf32> to vector<16x32xf32>
    %328 = vector.extract_strided_slice %243 {offsets = [0, 96], sizes = [16, 32], strides = [1, 1]} : vector<16x128xf32> to vector<16x32xf32>
    %329 = arith.truncf %326 : vector<16x32xf32> to vector<16x32xbf16>
    %330 = arith.truncf %327 : vector<16x32xf32> to vector<16x32xbf16>
    %cst_129 = arith.constant dense<0.000000e+00> : vector<16x16xf32>
    %331 = tpu.matmul %329, %330, %cst_129 {dimension_numbers = #tpu.dot_dimension_numbers<[1], [1], [0], [0], [0, 0, 1, 0], [], []>} : vector<16x32xbf16>, vector<16x32xbf16>, vector<16x16xf32> -> vector<16x16xf32>
    %cst_130 = arith.constant 0.176776692 : f32
    %332 = vector.broadcast %cst_130 : f32 to vector<16x16xf32>
    %333 = arith.mulf %331, %332 : vector<16x16xf32>
    %334 = arith.addf %333, %1 : vector<16x16xf32>
    %cst_131 = arith.constant dense<0xFF800000> : vector<16xf32>
    %335 = vector.multi_reduction <maximumf>, %334, %cst_131 [1] : vector<16x16xf32> to vector<16xf32>
    %336 = vector.shape_cast %335 : vector<16xf32> to vector<16x1xf32>
    %337 = vector.broadcast %336 : vector<16x1xf32> to vector<16x16xf32>
    %338 = arith.subf %334, %337 : vector<16x16xf32>
    %339 = math.exp %338 : vector<16x16xf32>
    %cst_132 = arith.constant dense<0.000000e+00> : vector<16xf32>
    %340 = vector.multi_reduction <add>, %339, %cst_132 [1] : vector<16x16xf32> to vector<16xf32>
    %341 = vector.shape_cast %340 : vector<16xf32> to vector<16x1xf32>
    %342 = tpu.reciprocal %341 {approx = true} : vector<16x1xf32> -> vector<16x1xf32>
    %343 = vector.broadcast %342 : vector<16x1xf32> to vector<16x16xf32>
    %344 = arith.mulf %339, %343 : vector<16x16xf32>
    %345 = arith.truncf %344 : vector<16x16xf32> to vector<16x16xbf16>
    %346 = arith.truncf %328 : vector<16x32xf32> to vector<16x32xbf16>
    %cst_133 = arith.constant dense<0.000000e+00> : vector<16x32xf32>
    %347 = tpu.matmul %345, %346, %cst_133 {dimension_numbers = #tpu.dot_dimension_numbers<[1], [0], [0], [1], [0, 0, 1, 1], [], []>} : vector<16x16xbf16>, vector<16x32xbf16>, vector<16x32xf32> -> vector<16x32xf32>
    %c1_134 = arith.constant 1 : index
    %c96_135 = arith.constant 96 : index
    %c0_136 = arith.constant 0 : index
    %348 = vector.load %arg6[%c1_134, %c96_135, %c0_136] : memref<2x128x128xbf16, #tpu.memory_space<vmem>>, vector<1x32x128xbf16>
    %349 = vector.shape_cast %348 : vector<1x32x128xbf16> to vector<32x128xbf16>
    %350 = arith.truncf %347 : vector<16x32xf32> to vector<16x32xbf16>
    %cst_137 = arith.constant dense<0.000000e+00> : vector<16x128xf32>
    %351 = tpu.matmul %350, %349, %cst_137 {dimension_numbers = #tpu.dot_dimension_numbers<[1], [0], [0], [1], [0, 0, 1, 1], [], []>} : vector<16x32xbf16>, vector<32x128xbf16>, vector<16x128xf32> -> vector<16x128xf32>
    %352 = arith.addf %325, %351 : vector<16x128xf32>
    %c1_138 = arith.constant 1 : index
    %c0_139 = arith.constant 0 : index
    %c0_140 = arith.constant 0 : index
    %353 = vector.load %arg7[%c1_138, %c0_139, %c0_140] : memref<2x1x128xf32, #tpu.memory_space<vmem>>, vector<1x1x128xf32>
    %354 = vector.shape_cast %353 : vector<1x1x128xf32> to vector<1x128xf32>
    %355 = vector.broadcast %354 : vector<1x128xf32> to vector<16x128xf32>
    %356 = arith.addf %352, %355 : vector<16x128xf32>
    %357 = arith.addf %356, %232 : vector<16x128xf32>
    %c1_141 = arith.constant 1 : index
    %c0_142 = arith.constant 0 : index
    %c0_143 = arith.constant 0 : index
    %358 = vector.load %arg8[%c1_141, %c0_142, %c0_143] : memref<2x1x128xf32, #tpu.memory_space<vmem>>, vector<1x1x128xf32>
    %359 = vector.shape_cast %358 : vector<1x1x128xf32> to vector<1x128xf32>
    %c1_144 = arith.constant 1 : index
    %c0_145 = arith.constant 0 : index
    %c0_146 = arith.constant 0 : index
    %360 = vector.load %arg9[%c1_144, %c0_145, %c0_146] : memref<2x1x128xf32, #tpu.memory_space<vmem>>, vector<1x1x128xf32>
    %361 = vector.shape_cast %360 : vector<1x1x128xf32> to vector<1x128xf32>
    %cst_147 = arith.constant dense<0.000000e+00> : vector<16xf32>
    %362 = vector.multi_reduction <add>, %357, %cst_147 [1] : vector<16x128xf32> to vector<16xf32>
    %363 = vector.shape_cast %362 : vector<16xf32> to vector<16x1xf32>
    %cst_148 = arith.constant 1.280000e+02 : f32
    %364 = vector.broadcast %cst_148 : f32 to vector<16x1xf32>
    %365 = arith.divf %363, %364 : vector<16x1xf32>
    %366 = vector.broadcast %365 : vector<16x1xf32> to vector<16x128xf32>
    %367 = arith.subf %357, %366 : vector<16x128xf32>
    %368 = arith.mulf %367, %367 : vector<16x128xf32>
    %cst_149 = arith.constant dense<0.000000e+00> : vector<16xf32>
    %369 = vector.multi_reduction <add>, %368, %cst_149 [1] : vector<16x128xf32> to vector<16xf32>
    %370 = vector.shape_cast %369 : vector<16xf32> to vector<16x1xf32>
    %cst_150 = arith.constant 1.280000e+02 : f32
    %371 = vector.broadcast %cst_150 : f32 to vector<16x1xf32>
    %372 = arith.divf %370, %371 : vector<16x1xf32>
    %373 = vector.broadcast %365 : vector<16x1xf32> to vector<16x128xf32>
    %374 = arith.subf %357, %373 : vector<16x128xf32>
    %cst_151 = arith.constant 9.99999996E-13 : f32
    %375 = vector.broadcast %cst_151 : f32 to vector<16x1xf32>
    %376 = arith.addf %372, %375 : vector<16x1xf32>
    %377 = math.rsqrt %376 : vector<16x1xf32>
    %378 = vector.broadcast %377 : vector<16x1xf32> to vector<16x128xf32>
    %379 = arith.mulf %374, %378 : vector<16x128xf32>
    %380 = vector.broadcast %359 : vector<1x128xf32> to vector<16x128xf32>
    %381 = arith.mulf %379, %380 : vector<16x128xf32>
    %382 = vector.broadcast %361 : vector<1x128xf32> to vector<16x128xf32>
    %383 = arith.addf %381, %382 : vector<16x128xf32>
    %c1_152 = arith.constant 1 : index
    %c0_153 = arith.constant 0 : index
    %c0_154 = arith.constant 0 : index
    %384 = vector.load %arg10[%c1_152, %c0_153, %c0_154] : memref<2x128x256xbf16, #tpu.memory_space<vmem>>, vector<1x128x256xbf16>
    %385 = vector.shape_cast %384 : vector<1x128x256xbf16> to vector<128x256xbf16>
    %386 = arith.truncf %383 : vector<16x128xf32> to vector<16x128xbf16>
    %cst_155 = arith.constant dense<0.000000e+00> : vector<16x256xf32>
    %387 = tpu.matmul %386, %385, %cst_155 {dimension_numbers = #tpu.dot_dimension_numbers<[1], [0], [0], [1], [0, 0, 1, 1], [], []>} : vector<16x128xbf16>, vector<128x256xbf16>, vector<16x256xf32> -> vector<16x256xf32>
    %c1_156 = arith.constant 1 : index
    %c0_157 = arith.constant 0 : index
    %c0_158 = arith.constant 0 : index
    %388 = vector.load %arg11[%c1_156, %c0_157, %c0_158] : memref<2x1x256xf32, #tpu.memory_space<vmem>>, vector<1x1x256xf32>
    %389 = vector.shape_cast %388 : vector<1x1x256xf32> to vector<1x256xf32>
    %390 = vector.broadcast %389 : vector<1x256xf32> to vector<16x256xf32>
    %391 = arith.addf %387, %390 : vector<16x256xf32>
    %392 = arith.mulf %391, %391 : vector<16x256xf32>
    %393 = arith.mulf %391, %392 : vector<16x256xf32>
    %cst_159 = arith.constant 4.471500e-02 : f32
    %394 = vector.broadcast %cst_159 : f32 to vector<16x256xf32>
    %395 = arith.mulf %394, %393 : vector<16x256xf32>
    %396 = arith.addf %391, %395 : vector<16x256xf32>
    %cst_160 = arith.constant 0.797884583 : f32
    %397 = vector.broadcast %cst_160 : f32 to vector<16x256xf32>
    %398 = arith.mulf %397, %396 : vector<16x256xf32>
    %399 = math.tanh %398 : vector<16x256xf32>
    %cst_161 = arith.constant 1.000000e+00 : f32
    %400 = vector.broadcast %cst_161 : f32 to vector<16x256xf32>
    %401 = arith.addf %400, %399 : vector<16x256xf32>
    %cst_162 = arith.constant 5.000000e-01 : f32
    %402 = vector.broadcast %cst_162 : f32 to vector<16x256xf32>
    %403 = arith.mulf %402, %401 : vector<16x256xf32>
    %404 = arith.mulf %391, %403 : vector<16x256xf32>
    %c1_163 = arith.constant 1 : index
    %c0_164 = arith.constant 0 : index
    %c0_165 = arith.constant 0 : index
    %405 = vector.load %arg12[%c1_163, %c0_164, %c0_165] : memref<2x256x128xbf16, #tpu.memory_space<vmem>>, vector<1x256x128xbf16>
    %406 = vector.shape_cast %405 : vector<1x256x128xbf16> to vector<256x128xbf16>
    %407 = arith.truncf %404 : vector<16x256xf32> to vector<16x256xbf16>
    %cst_166 = arith.constant dense<0.000000e+00> : vector<16x128xf32>
    %408 = tpu.matmul %407, %406, %cst_166 {dimension_numbers = #tpu.dot_dimension_numbers<[1], [0], [0], [1], [0, 0, 1, 1], [], []>} : vector<16x256xbf16>, vector<256x128xbf16>, vector<16x128xf32> -> vector<16x128xf32>
    %c1_167 = arith.constant 1 : index
    %c0_168 = arith.constant 0 : index
    %c0_169 = arith.constant 0 : index
    %409 = vector.load %arg13[%c1_167, %c0_168, %c0_169] : memref<2x1x128xf32, #tpu.memory_space<vmem>>, vector<1x1x128xf32>
    %410 = vector.shape_cast %409 : vector<1x1x128xf32> to vector<1x128xf32>
    %411 = vector.broadcast %410 : vector<1x128xf32> to vector<16x128xf32>
    %412 = arith.addf %408, %411 : vector<16x128xf32>
    %413 = arith.addf %412, %383 : vector<16x128xf32>
    %c1_170 = arith.constant 1 : index
    %c0_171 = arith.constant 0 : index
    %c0_172 = arith.constant 0 : index
    %414 = vector.load %arg14[%c1_170, %c0_171, %c0_172] : memref<2x1x128xf32, #tpu.memory_space<vmem>>, vector<1x1x128xf32>
    %415 = vector.shape_cast %414 : vector<1x1x128xf32> to vector<1x128xf32>
    %c1_173 = arith.constant 1 : index
    %c0_174 = arith.constant 0 : index
    %c0_175 = arith.constant 0 : index
    %416 = vector.load %arg15[%c1_173, %c0_174, %c0_175] : memref<2x1x128xf32, #tpu.memory_space<vmem>>, vector<1x1x128xf32>
    %417 = vector.shape_cast %416 : vector<1x1x128xf32> to vector<1x128xf32>
    %cst_176 = arith.constant dense<0.000000e+00> : vector<16xf32>
    %418 = vector.multi_reduction <add>, %413, %cst_176 [1] : vector<16x128xf32> to vector<16xf32>
    %419 = vector.shape_cast %418 : vector<16xf32> to vector<16x1xf32>
    %cst_177 = arith.constant 1.280000e+02 : f32
    %420 = vector.broadcast %cst_177 : f32 to vector<16x1xf32>
    %421 = arith.divf %419, %420 : vector<16x1xf32>
    %422 = vector.broadcast %421 : vector<16x1xf32> to vector<16x128xf32>
    %423 = arith.subf %413, %422 : vector<16x128xf32>
    %424 = arith.mulf %423, %423 : vector<16x128xf32>
    %cst_178 = arith.constant dense<0.000000e+00> : vector<16xf32>
    %425 = vector.multi_reduction <add>, %424, %cst_178 [1] : vector<16x128xf32> to vector<16xf32>
    %426 = vector.shape_cast %425 : vector<16xf32> to vector<16x1xf32>
    %cst_179 = arith.constant 1.280000e+02 : f32
    %427 = vector.broadcast %cst_179 : f32 to vector<16x1xf32>
    %428 = arith.divf %426, %427 : vector<16x1xf32>
    %429 = vector.broadcast %421 : vector<16x1xf32> to vector<16x128xf32>
    %430 = arith.subf %413, %429 : vector<16x128xf32>
    %cst_180 = arith.constant 9.99999996E-13 : f32
    %431 = vector.broadcast %cst_180 : f32 to vector<16x1xf32>
    %432 = arith.addf %428, %431 : vector<16x1xf32>
    %433 = math.rsqrt %432 : vector<16x1xf32>
    %434 = vector.broadcast %433 : vector<16x1xf32> to vector<16x128xf32>
    %435 = arith.mulf %430, %434 : vector<16x128xf32>
    %436 = vector.broadcast %415 : vector<1x128xf32> to vector<16x128xf32>
    %437 = arith.mulf %435, %436 : vector<16x128xf32>
    %438 = vector.broadcast %417 : vector<1x128xf32> to vector<16x128xf32>
    %439 = arith.addf %437, %438 : vector<16x128xf32>
    %c0_181 = arith.constant 0 : index
    %c0_182 = arith.constant 0 : index
    %440 = vector.load %arg16[%c0_181, %c0_182] : memref<128x128xbf16, #tpu.memory_space<vmem>>, vector<128x128xbf16>
    %441 = arith.truncf %439 : vector<16x128xf32> to vector<16x128xbf16>
    %cst_183 = arith.constant dense<0.000000e+00> : vector<16x128xf32>
    %442 = tpu.matmul %441, %440, %cst_183 {dimension_numbers = #tpu.dot_dimension_numbers<[1], [0], [0], [1], [0, 0, 1, 1], [], []>} : vector<16x128xbf16>, vector<128x128xbf16>, vector<16x128xf32> -> vector<16x128xf32>
    %c0_184 = arith.constant 0 : index
    %c0_185 = arith.constant 0 : index
    %443 = vector.load %arg17[%c0_184, %c0_185] : memref<1x128xf32, #tpu.memory_space<vmem>>, vector<1x128xf32>
    %444 = vector.broadcast %443 : vector<1x128xf32> to vector<16x128xf32>
    %445 = arith.addf %442, %444 : vector<16x128xf32>
    %c0_186 = arith.constant 0 : index
    %c0_187 = arith.constant 0 : index
    %446 = vector.load %arg18[%c0_186, %c0_187] : memref<16x128xf32, #tpu.memory_space<vmem>>, vector<16x128xf32>
    tpu.vector_store %arg18[%c0_186, %c0_187], %445 {strides = array<i32>} : memref<16x128xf32, #tpu.memory_space<vmem>>, vector<16x128xf32>,
    return
  }
}

</mosaic_0001>

<bundles_post_ra>
// kernel: model_forward.1
= control target key start
LH: loop header
LB: loop body
LE: loop exit
PB: predicated region body
PF: predicated region fallthrough
CT: control target
= control target key end

     0   :  { %s4840_s0 = inlined_call_operand.vmem [shape: f32[16,128], index: 0, kind: input, shape index: {}]   ;;  %s4841_s1 = inlined_call_operand.vmem [shape: f32[16,16], index: 1, kind: input, shape index: {}]   ;;  %s4842_s2 = inlined_call_operand.vmem [shape: f32[1,128], index: 2, kind: input, shape index: {}]   ;;  %s4843_s3 = inlined_call_operand.vmem [shape: f32[1,128], index: 3, kind: input, shape index: {}]   ;;  %s4844_s4 = inlined_call_operand.hbm [shape: bf16[2,128,384], index: 4, kind: input, shape index: {}]   ;;  %s4845_s5 = inlined_call_operand.vmem [shape: f32[2,1,384], index: 5, kind: input, shape index: {}]   ;;  %s4846_s6 = inlined_call_operand.hbm [shape: bf16[2,128,128], index: 6, kind: input, shape index: {}]   ;;  %s4847_s7 = inlined_call_operand.vmem [shape: f32[2,1,128], index: 7, kind: input, shape index: {}]   ;;  %s4848_s8 = inlined_call_operand.vmem [shape: f32[2,1,128], index: 8, kind: input, shape index: {}]   ;;  %s4849_s9 = inlined_call_operand.vmem [shape: f32[2,1,128], index: 9, kind: input, shape index: {}]   ;;  %s4850_s10 = inlined_call_operand.vmem [shape: bf16[2,128,256], index: 10, kind: input, shape index: {}]   ;;  %s4851_s11 = inlined_call_operand.vmem [shape: f32[2,1,256], index: 11, kind: input, shape index: {}]   ;;  %s4852_s12 = inlined_call_operand.hbm [shape: bf16[2,256,128], index: 12, kind: input, shape index: {}]   ;;  %s4853_s13 = inlined_call_operand.vmem [shape: f32[2,1,128], index: 13, kind: input, shape index: {}]   ;;  %s4854_s14 = inlined_call_operand.vmem [shape: f32[2,1,128], index: 14, kind: input, shape index: {}]   ;;  %s4855_s15 = inlined_call_operand.vmem [shape: f32[2,1,128], index: 15, kind: input, shape index: {}]   ;;  %s4856_s16 = inlined_call_operand.hbm [shape: bf16[128,128], index: 16, kind: input, shape index: {}]   ;;  %s4857_s17 = inlined_call_operand.vmem [shape: f32[1,128], index: 17, kind: input, shape index: {}]   ;;  %s4858_s18 = inlined_call_operand.vmem [shape: f32[16,128], index: 18, kind: output, shape index: {}]  }
   0x1   :  { %4865 = sst [smem:[#allocation12_spill]] %s4840_s0 }
   0x2   :  { %4866 = sst [smem:[#allocation13_spill]] %s4841_s1 }
   0x3   :  { %4867 = sst [smem:[#allocation14_spill]] %s4842_s2 }
   0x4   :  { %23 = vsyncpa [#allocation3], 0 }
   0x5   :  { %24 = vsyncpa [#allocation5], 0 }
   0x6   :  { %25 = vsyncpa [#allocation8], 0  ;;  %s4155_s27 = smov [#allocation4]   ;;  %s4061_s0 = scalar_lea.hbm %s4846_s6, 2048 }
   0x7   :  { %s53_s28 = sshll.u32 %s4155_s27, 4  ;;  %p4062_p0 = scmp.ne.s32.totalorder %s4846_s6, %s4061_s0  ;;  %s54_s28 = int_to_ptr.vmem [resolvable:$true] %s53_s28 }
   0x8   :  { %p4065_p1 = scmp.lt.u32.totalorder %s4061_s0, %s4846_s6 }
   0xa   :  { %p4067_p2 = pnand %p4065_p1, %p4062_p0 }
   0xc   :  { %4070 = shalt.err (!%p4067_p2)
}
   0xd   :  { %s4071_s22 = scalar_lea.vmem %s54_s28, 2048  ;;  %p4076_p4 = scmp.lt.s32.totalorder %s54_s28, %s54_s28 }
   0xe   :  { %p4072_p3 = scmp.ne.s32.totalorder %s54_s28, %s4071_s22  ;;  %p4077_p5 = scmp.lt.s32.totalorder %s4071_s22, %s4071_s22 }
  0x10   :  { %p4078_p6 = por %p4077_p5, %p4076_p4 }
  0x12   :  { %p4079_p7 = pnand %p4078_p6, %p4072_p3 }
  0x14   :  { %4082 = shalt.err (!%p4079_p7)
}
  0x15   :  { %s4861_s2 = smov 64   ;;  %s4863_s23 = smov 4  }
  0x16   :  { %59 = dma.hbm_to_vmem [thread:$0]  %s4846_s6, 2048, %s54_s28, [#allocation5], %s4861_s2, %s4861_s2, %s4863_s23  }
  0x17   :  { %s4158_s26 = smov [#allocation2]   ;;  %s4083_s0 = scalar_lea.hbm %s4844_s4, 6144 }
  0x18   :  { %s39_s27 = sshll.u32 %s4158_s26, 4  ;;  %p4084_p8 = scmp.ne.s32.totalorder %s4844_s4, %s4083_s0  ;;  %s40_s27 = int_to_ptr.vmem [resolvable:$true] %s39_s27 }
  0x19   :  { %p4087_p9 = scmp.lt.u32.totalorder %s4083_s0, %s4844_s4 }
  0x1b   :  { %p4089_p10 = pnand %p4087_p9, %p4084_p8 }
  0x1d   :  { %4092 = shalt.err (!%p4089_p10)
}
  0x1e   :  { %s4093_s22 = scalar_lea.vmem %s40_s27, 6144  ;;  %p4098_p12 = scmp.lt.s32.totalorder %s40_s27, %s40_s27 }
  0x1f   :  { %p4094_p11 = scmp.ne.s32.totalorder %s40_s27, %s4093_s22  ;;  %p4099_p13 = scmp.lt.s32.totalorder %s4093_s22, %s4093_s22 }
  0x21   :  { %p4100_p0 = por %p4099_p13, %p4098_p12 }
  0x23   :  { %p4101_p1 = pnand %p4100_p0, %p4094_p11 }
  0x25   :  { %4104 = shalt.err (!%p4101_p1)
}
  0x26   :  { %s4159_s6 = smov 192   ;;  %s4160_s28 = smov 12  }
  0x27   :  { %45 = dma.hbm_to_vmem [thread:$0]  %s4844_s4, 6144, %s40_s27, [#allocation3], %s4159_s6, %s4159_s6, %s4160_s28  }
  0x28   :  { %s4161_s26 = smov [#allocation6]   ;;  %s4162_s30 = smov [#allocation7]  }
  0x29   :  { %s75_s29 = sshll.u32 %s4161_s26, 4  ;;  %s93_s19 = sshll.u32 %s4162_s30, 4  ;;  %s76_s29 = int_to_ptr.vmem [resolvable:$true] %s75_s29  ;;  %s4290_s19 = int_to_ptr.vmem [resolvable:$true] %s93_s19 }
  0x2a   :  { %s4105_s20 = scalar_lea.hbm %s4852_s12, 4096 }
  0x2b   :  { %p4106_p2 = scmp.ne.s32.totalorder %s4852_s12, %s4105_s20  ;;  %p4109_p3 = scmp.lt.u32.totalorder %s4105_s20, %s4852_s12 }
  0x2d   :  { %p4111_p4 = pnand %p4109_p3, %p4106_p2 }
  0x2f   :  { %4114 = shalt.err (!%p4111_p4)
}
  0x30   :  { %s4115_s4 = scalar_lea.vmem %s76_s29, 4096  ;;  %p4120_p6 = scmp.lt.s32.totalorder %s76_s29, %s76_s29 }
  0x31   :  { %p4116_p5 = scmp.ne.s32.totalorder %s76_s29, %s4115_s4  ;;  %p4121_p7 = scmp.lt.s32.totalorder %s4115_s4, %s4115_s4 }
  0x33   :  { %p4122_p8 = por %p4121_p7, %p4120_p6 }
  0x35   :  { %p4123_p9 = pnand %p4122_p8, %p4116_p5 }
  0x37   :  { %4126 = shalt.err (!%p4123_p9)
}
  0x38   :  { %s4868_s27 = smov 4   ;;  %s4869_s6 = smov 64  }
  0x39   :  { %81 = dma.hbm_to_vmem [thread:$0]  %s4852_s12, 4096, %s76_s29, [#allocation5], %s4869_s6, %s4869_s6, %s4868_s27  }
  0x3a   :  { %s4127_s2 = scalar_lea.hbm %s4856_s16, 1024 }
  0x3b   :  { %p4128_p10 = scmp.ne.s32.totalorder %s4856_s16, %s4127_s2  ;;  %p4131_p11 = scmp.lt.u32.totalorder %s4127_s2, %s4856_s16 }
  0x3d   :  { %p4133_p12 = pnand %p4131_p11, %p4128_p10 }
  0x3f   :  { %4136 = shalt.err (!%p4133_p12)
}
  0x40   :  { %s4137_s20 = scalar_lea.vmem %s4290_s19, 1024  ;;  %p4142_p0 = scmp.lt.s32.totalorder %s4290_s19, %s4290_s19 }
  0x41   :  { %p4138_p13 = scmp.ne.s32.totalorder %s4290_s19, %s4137_s20  ;;  %p4143_p1 = scmp.lt.s32.totalorder %s4137_s20, %s4137_s20 }
  0x43   :  { %p4144_p2 = por %p4143_p1, %p4142_p0 }
  0x45   :  { %p4145_p3 = pnand %p4144_p2, %p4138_p13 }
  0x47   :  { %4148 = shalt.err (!%p4145_p3)
}
  0x48   :  { %99 = dma.hbm_to_vmem [thread:$0]  %s4856_s16, 1024, %s4290_s19, [#allocation8], %s4869_s6, %s4869_s6, %s4868_s27  }
  0x49   :  { %4149 = dma.done.wait [#allocation3], 6144  }
  0x4a   :  { %4150 = vsyncadd [#allocation3], 4294961152 }
  0x4b   :  { %4151 = dma.done.wait [#allocation5], 6144  }
  0x4c   :  { %4152 = vsyncadd [#allocation5], 4294961152 }
  0x4d   :  { %4153 = dma.done.wait [#allocation8], 1024  }
  0x4e   :  { %4154 = vsyncadd [#allocation8], 4294966272  ;;  %s4870_s4 = sld [smem:[#allocation12_spill]]  ;;  %v3791_v2 = vld [vmem:[#allocation2 + $0x4] ss:$12 sps:$4 sm:$0xff]   ;;  %v4163_v4 = vmov 0.0   ;;  %v195_v53 = vlaneseq }
  0x4f   :  { %v3793_v3 = vld [vmem:[#allocation2] ss:$12 sps:$4 sm:$0xff]   ;;  %3558 = vmatprep.subr.bf16.mxu1 %v4163_v4  ;;  %v3794_v5 = vld [vmem:[#allocation2 + $0x8] ss:$12 sps:$4 sm:$0xff]   ;;  %338 = vmatprep.subr.bf16.mxu0 %v3791_v2  ;;  %v3797_v15 = vld [vmem:[#allocation2 + $0x18] ss:$12 sps:$4 sm:$0xff]  }
  0x50   :  { %v3795_v6 = vld [vmem:[#allocation2 + $0x1c] ss:$12 sps:$4 sm:$0xff]   ;;  %339 = vmatpush1.bf16.msra.mxu0 %v3793_v3  ;;  %3559 = vmatpush3.bf16.msra.mxu1 %v3794_v5  ;;  %v3798_v16 = vld [vmem:[#allocation2 + $0x20] ss:$12 sps:$4 sm:$0xff]   ;;  %v3802_v19 = vld [vmem:[#allocation2 + $0x38] ss:$12 sps:$4 sm:$0xff]  }
  0x51   :  { %340 = vmatprep.subr.bf16.mxu0 %v3795_v6  ;;  %3560 = vmatprep.subr.bf16.mxu1 %v4163_v4  ;;  %v3799_v17 = vld [vmem:[#allocation2 + $0x34] ss:$12 sps:$4 sm:$0xff]   ;;  %v3801_v18 = vld [vmem:[#allocation2 + $0x30] ss:$12 sps:$4 sm:$0xff]   ;;  %v3803_v20 = vld [vmem:[#allocation2 + $0x4c] ss:$12 sps:$4 sm:$0xff]  }
  0x52   :  { %v3805_v21 = vld [vmem:[#allocation2 + $0x48] ss:$12 sps:$4 sm:$0xff]   ;;  %v3806_v22 = vld [vmem:[#allocation2 + $0x50] ss:$12 sps:$4 sm:$0xff]   ;;  %v3809_v24 = vld [vmem:[#allocation2 + $0x60] ss:$12 sps:$4 sm:$0xff]  }
  0x53   :  { %v3807_v23 = vld [vmem:[#allocation2 + $0x64] ss:$12 sps:$4 sm:$0xff]   ;;  %v3810_v25 = vld [vmem:[#allocation2 + $0x68] ss:$12 sps:$4 sm:$0xff]   ;;  %v3814_v28 = vld [vmem:[#allocation2 + $0x80] ss:$12 sps:$4 sm:$0xff]  }
  0x54   :  { %v115_v0 = vld [vmem:[%s4870_s4] sm:$0xff]  ;;  %v116_v1 = vld [vmem:[%s4870_s4 + $0x8] sm:$0xff]  ;;  %341 = vmatpush1.bf16.msra.mxu0 %v3797_v15  ;;  %3561 = vmatpush3.bf16.msra.mxu1 %v3798_v16  ;;  %v4164_v30 = vmov 0   ;;  %vm4165_vm0 = vmmov 0   ;;  %v3817_v31 = vld [vmem:[#allocation2 + $0x90] ss:$12 sps:$4 sm:$0xff]  }
  0x55   :  { %121 = vadd.xlane.f32.xlu0 %v115_v0  ;;  %3562 = vmatprep.subr.bf16.mxu1 %v4163_v4  ;;  %v3811_v26 = vld [vmem:[#allocation2 + $0x7c] ss:$12 sps:$4 sm:$0xff]   ;;  %v3813_v27 = vld [vmem:[#allocation2 + $0x78] ss:$12 sps:$4 sm:$0xff]   ;;  %v3815_v29 = vld [vmem:[#allocation2 + $0x94] ss:$12 sps:$4 sm:$0xff]  }
  0x56   :  { %342 = vmatprep.subr.bf16.mxu0 %v3799_v17  ;;  %370 = vmatprep.mubr.bf16.mxu0 %v4164_v30  ;;  %v3818_v32 = vld [vmem:[#allocation2 + $0x98] ss:$12 sps:$4 sm:$0xff]   ;;  %v3821_v34 = vld [vmem:[#allocation2 + $0xa8] ss:$12 sps:$4 sm:$0xff]   ;;  %v3822_v35 = vld [vmem:[#allocation2 + $0xb0] ss:$12 sps:$4 sm:$0xff]  }
  0x57   :  { %3574 = vmatprep.mubr.msk.bf16.mxu1 %vm4165_vm0, %v4163_v4  ;;  %v3819_v33 = vld [vmem:[#allocation2 + $0xac] ss:$12 sps:$4 sm:$0xff]   ;;  %s4871_s27 = sld [smem:[#allocation14_spill]]  ;;  %v3233_v48 = vld [vmem:[%s4843_s3] ss:$0 sm:$0xff]  ;;  %v4372_v54 = vshrl.u32 %v195_v53, 7 }
  0x58   :  { %343 = vmatpush1.bf16.msra.mxu0 %v3801_v18  ;;  %3563 = vmatpush3.bf16.msra.mxu1 %v3802_v19  ;;  %v193_v57 = vld [vmem:[%s4845_s5] sm:$0x7]  ;;  %vm424_vm1 = vcmask 261120   ;;  %s4872_s0 = sld [smem:[#allocation13_spill]]  ;;  %vm476_vm2 = vcmask 130048   ;;  %s4166_s12 = smov 96  }
  0x59   :  { %123 = vadd.xlane.f32.xlu0 %v116_v1  ;;  %3564 = vmatprep.subr.bf16.mxu1 %v4163_v4  ;;  %v4375_v55 = vsub.s32 0, %v4372_v54  ;;  %v205_v56 = vsub.s32 2, %v4372_v54  ;;  %v4382_v58 = vsub.s32 1, %v4372_v54  ;;  %s4167_s29 = smov 32  }
  0x5a   :  { %344 = vmatprep.subr.bf16.mxu0 %v3803_v20 }
  0x5b   :  { %v198_v59 = vrot.slane %v193_v57, %v4375_v55  ;;  %v206_v60 = vrot.slane %v193_v57, %v205_v56  ;;  %v202_v63 = vrot.slane %v193_v57, %v4382_v58 }
  0x5c   :  { %345 = vmatpush1.bf16.msra.mxu0 %v3805_v21  ;;  %3565 = vmatpush3.bf16.msra.mxu1 %v3806_v22 }
  0x5d   :  { %3566 = vmatprep.subr.bf16.mxu1 %v4163_v4  ;;  %346 = vmatprep.subr.bf16.mxu0 %v3807_v23  ;;  %v3232_v44 = vld [vmem:[%s4871_s27] ss:$0 sm:$0xff] }
  0x5e   :  { %v4406_v18 = vld [vmem:[%s4872_s0] sm:$0xff]  ;;  %v4411_v22 = vld [vmem:[%s4872_s0 + $0x8] sm:$0xff] }
  0x60   :  { %347 = vmatpush1.bf16.msra.mxu0 %v3809_v24  ;;  %3567 = vmatpush3.bf16.msra.mxu1 %v3810_v25 }
  0x61   :  { %348 = vmatprep.subr.bf16.mxu0 %v3811_v26  ;;  %3568 = vmatprep.subr.bf16.mxu1 %v4163_v4 }
  0x64   :  { %349 = vmatpush1.bf16.msra.mxu0 %v3813_v27  ;;  %3569 = vmatpush3.bf16.msra.mxu1 %v3814_v28 }
  0x65   :  { %350 = vmatprep.subr.bf16.mxu0 %v3815_v29  ;;  %3570 = vmatprep.subr.bf16.mxu1 %v4163_v4 }
  0x68   :  { %351 = vmatpush1.bf16.msra.mxu0 %v3817_v31  ;;  %3571 = vmatpush3.bf16.msra.mxu1 %v3818_v32 }
  0x69   :  { %352 = vmatprep.subr.bf16.mxu0 %v3819_v33  ;;  %3572 = vmatprep.subr.bf16.mxu1 %v4163_v4 }
  0x6c   :  { %353 = vmatpush1.bf16.msra.mxu0 %v3821_v34  ;;  %3573 = vmatpush3.bf16.msra.mxu1 %v3822_v35 }
  0x6d   :  { %3578 = vmatprep.subr.bf16.mxu1 %v4163_v4  ;;  %3602 = vmatprep.subr.bf16.mxu0 %v4163_v4 }
  0xe2   :  { %v122_v7 = vpop.xlane.xlu0 %121 }
  0xe3   :  { %v126_v8 = vmul.f32 0.0078125, %v122_v7 }
  0xe5   :  { %v4335_v9 = vsub.f32 %v115_v0, %v126_v8 }
  0xe6   :  { %v124_v10 = vpop.xlane.xlu0 %123 }
  0xe7   :  { %v127_v11 = vmul.f32 0.0078125, %v124_v10  ;;  %v130_v12 = vmul.f32 %v4335_v9, %v4335_v9 }
  0xe9   :  { %v4339_v13 = vsub.f32 %v116_v1, %v127_v11  ;;  %132 = vadd.xlane.f32.xlu1 %v130_v12 }
  0xeb   :  { %v131_v14 = vmul.f32 %v4339_v13, %v4339_v13 }
  0xed   :  { %134 = vadd.xlane.f32.xlu1 %v131_v14 }
 0x176   :  { %v133_v36 = vpop.xlane.xlu1 %132 }
 0x177   :  { %v136_v37 = vmul.f32 0.0078125, %v133_v36 }
 0x179   :  { %v138_v38 = vadd.f32 1e-12, %v136_v37 }
 0x17a   :  { %v135_v39 = vpop.xlane.xlu1 %134 }
 0x17b   :  { %3959 = vrsqrt.f32 %v138_v38  ;;  %v137_v40 = vmul.f32 0.0078125, %v135_v39 }
 0x17d   :  { %v139_v41 = vadd.f32 1e-12, %v137_v40 }
 0x17f   :  { %3961 = vrsqrt.f32 %v139_v41 }
 0x185   :  { %v3960_v42 = vpop.eup %3959 }
 0x186   :  { %v142_v43 = vmul.f32 %v3960_v42, %v4335_v9 }
 0x188   :  { %v150_v47 = vmul.f32 %v3232_v44, %v142_v43 }
 0x189   :  { %v3962_v45 = vpop.eup %3961 }
 0x18a   :  { %v143_v46 = vmul.f32 %v3962_v45, %v4339_v13  ;;  %v4362_v50 = vadd.f32 %v3233_v48, %v150_v47 }
 0x18c   :  { %v151_v49 = vmul.f32 %v3232_v44, %v143_v46 }
 0x18e   :  { %v4364_v51 = vadd.f32 %v3233_v48, %v151_v49 }
 0x190   :  { %v192_v52 = vpack.c.bf16 %v4364_v51, %v4362_v50 }
 0x192   :  { %371 = vmatmul.mubr.bf16.vlgmr.msra.gmra.mrb[0].mxu0 %v192_v52  ;;  %3575 = vmatmul.mubr.bf16.vlgmr.msra.gmra.mrb[0].mxu1 %v192_v52 }
 0x193   :  { %3580 = vmatprep.mubr.msk.bf16.mxu1 %vm4165_vm0, %v4163_v4  ;;  %3606 = vmatprep.mubr.msk.bf16.mxu0 %vm4165_vm0, %v4163_v4 }
 0x265   :  { %v372_v61 = vpop.f32.mrb[0].mxu0  ;;  %v415_v62 = vpop.f32.mrb[0].mxu1 }
 0x266   :  { %v374_v0 = vpop.f32.mrb[1].mxu0  ;;  %v3576_v1 = vpop.f32.mrb[1].mxu1  ;;  %v373_v5 = vadd.f32 %v372_v61, %v198_v59  ;;  %v416_v6 = vadd.f32 %v415_v62, %v206_v60 }
 0x267   :  { %v376_v2 = vpop.f32.mrb[2].mxu0  ;;  %v418_v3 = vpop.f32.mrb[2].mxu1  ;;  %v375_v11 = vadd.f32 %v374_v0, %v202_v63 }
 0x268   :  { %v377_v7 = vadd.f32 %v376_v2, %v198_v59  ;;  %v419_v8 = vadd.f32 %v418_v3, %v206_v60  ;;  %v378_v9 = vpop.f32.mrb[3].mxu0  ;;  %v3577_v10 = vpop.f32.mrb[3].mxu1 }
 0x269   :  { %v379_v12 = vadd.f32 %v378_v9, %v202_v63 }
 0x26a   :  { %v4388_v13 = vpack.c.bf16 %v377_v7, %v373_v5  ;;  %v4390_v14 = vpack.c.bf16 %v419_v8, %v416_v6 }
 0x26b   :  { %v4392_v15 = vpack.c.bf16 %v379_v12, %v375_v11 }
 0x26d   :  { %v429_v16 = vsel %vm424_vm1, %v4392_v15, 0 }
 0x26e   :  { %3579 = vmatpush3.bf16.xpose.msra.mxu1 %v429_v16 }
 0x26f   :  { %3584 = vmatprep.subr.bf16.mxu1 %v4163_v4 }
 0x275   :  { %3581 = vmatmul.mubr.msk.bf16.vlgmr.msra.gmra.mrb[4].mxu1 %vm424_vm1, %v4388_v13 }
 0x276   :  { %3585 = vmatpush3.bf16.msra.mxu1 %v4390_v14  ;;  %3586 = vmatprep.mubr.msk.bf16.mxu1 %vm4165_vm0, %v4163_v4 }
 0x277   :  { %3590 = vmatprep.subr.bf16.mxu1 %v4163_v4 }
 0x348   :  { %v465_v17 = vpop.f32.mrb[4].mxu1 }
 0x349   :  { %v472_v19 = vmul.f32 0.17677669, %v465_v17  ;;  %v3582_v20 = vpop.f32.mrb[5].mxu1 }
 0x34a   :  { %v468_v21 = vpop.f32.mrb[6].mxu1 }
 0x34b   :  { %v473_v23 = vmul.f32 0.17677669, %v468_v21  ;;  %v3583_v24 = vpop.f32.mrb[7].mxu1  ;;  %v474_v25 = vadd.f32 %v472_v19, %v4406_v18 }
 0x34c   :  { %v3826_v24 = vld [vmem:[#allocation4 + $0x18] sm:$0xff]  }
 0x34d   :  { %v477_v26 = vsel %vm476_vm2, %v474_v25, -inf  ;;  %v475_v27 = vadd.f32 %v473_v23, %v4411_v22  ;;  %v3825_v23 = vld [vmem:[#allocation4 + $0x10] sm:$0xff]  }
 0x34e   :  { %478 = vmax.xlane.f32.xlu0 %v477_v26  ;;  %3603 = vmatpush3.bf16.msra.mxu0 %v3825_v23 }
 0x34f   :  { %v480_v28 = vsel %vm476_vm2, %v475_v27, -inf  ;;  %3604 = vmatprep.subr.bf16.mxu0 %v4163_v4 }
 0x350   :  { %481 = vmax.xlane.f32.xlu1 %v480_v28 }
 0x352   :  { %3605 = vmatpush3.bf16.msra.mxu0 %v3826_v24 }
 0x353   :  { %3618 = vmatprep.subr.bf16.mxu0 %v4163_v4 }
 0x3db   :  { %v479_v29 = vpop.xlane.xlu0 %478 }
 0x3dc   :  { %v483_v31 = vsub.f32 %v474_v25, %v479_v29 }
 0x3dd   :  { %v482_v32 = vpop.xlane.xlu1 %481 }
 0x3de   :  { %v485_v33 = vmul.f32 1.442695, %v483_v31  ;;  %v484_v34 = vsub.f32 %v475_v27, %v482_v32 }
 0x3e0   :  { %3963 = vpow2.f32 %v485_v33  ;;  %v487_v35 = vmul.f32 1.442695, %v484_v34  ;;  %v3823_v33 = vld [vmem:[#allocation4] sm:$0xff]  }
 0x3e2   :  { %3965 = vpow2.f32 %v487_v35  ;;  %v3824_v35 = vld [vmem:[#allocation4 + $0x8] sm:$0xff]  }
 0x3ea   :  { %v3964_v36 = vpop.eup %3963 }
 0x3eb   :  { %v489_v37 = vsel %vm476_vm2, %v3964_v36, 0.0 }
 0x3ec   :  { %v3966_v38 = vpop.eup %3965  ;;  %490 = vadd.xlane.f32.xlu0 %v489_v37 }
 0x3ed   :  { %v492_v39 = vsel %vm476_vm2, %v3966_v38, 0.0 }
 0x3ee   :  { %493 = vadd.xlane.f32.xlu1 %v492_v39 }
 0x3ff   :  { %551 = vrot.lane.b32.xlu1 %v4388_v13, %s4166_s12 }
 0x402   :  { %554 = vrot.lane.b32.xlu0 %v4392_v15, %s4166_s12 }
 0x479   :  { %v491_v40 = vpop.xlane.xlu0 %490 }
 0x47a   :  { %3967 = vrcp.f32 %v491_v40 }
 0x47b   :  { %v494_v41 = vpop.xlane.xlu1 %493 }
 0x47c   :  { %3969 = vrcp.f32 %v494_v41 }
 0x47d   :  { %v555_v46 = vpop.permute.xlu0 %554 }
 0x47e   :  { %v560_v48 = vsel %vm424_vm1, %v555_v46, 0 }
 0x47f   :  { %v552_v49 = vpop.permute.xlu1 %551 }
 0x484   :  { %v3968_v42 = vpop.eup %3967 }
 0x485   :  { %v497_v44 = vmul.f32 %v3968_v42, %v3964_v36 }
 0x486   :  { %v3970_v43 = vpop.eup %3969 }
 0x487   :  { %v498_v45 = vmul.f32 %v3970_v43, %v3966_v38 }
 0x489   :  { %v499_v47 = vpack.c.bf16 %v498_v45, %v497_v44 }
 0x48b   :  { %3587 = vmatmul.mubr.msk.bf16.vlgmr.msra.gmra.mrb[8].mxu1 %vm476_vm2, %v499_v47 }
 0x48c   :  { %3591 = vmatpush3.bf16.xpose.msra.mxu1 %v560_v48  ;;  %3592 = vmatprep.mubr.msk.bf16.mxu1 %vm4165_vm0, %v4163_v4 }
 0x48d   :  { %3596 = vmatprep.subr.bf16.mxu1 %v4163_v4 }
 0x493   :  { %3593 = vmatmul.mubr.msk.bf16.vlgmr.msra.gmra.mrb[12].mxu1 %vm424_vm1, %v552_v49 }
 0x494   :  { %3598 = vmatprep.mubr.msk.bf16.mxu1 %vm4165_vm0, %v4163_v4 }
 0x55e   :  { %v538_v52 = vpop.f32.mrb[8].mxu1 }
 0x55f   :  { %v3588_v53 = vpop.f32.mrb[9].mxu1 }
 0x560   :  { %v541_v57 = vpop.f32.mrb[10].mxu1 }
 0x561   :  { %v549_v59 = vpack.c.bf16 %v541_v57, %v538_v52  ;;  %v3589_v60 = vpop.f32.mrb[11].mxu1 }
 0x566   :  { %v596_v61 = vpop.f32.mrb[12].mxu1 }
 0x567   :  { %v603_v62 = vmul.f32 0.17677669, %v596_v61  ;;  %v3594_v63 = vpop.f32.mrb[13].mxu1 }
 0x568   :  { %v599_v0 = vpop.f32.mrb[14].mxu1 }
 0x569   :  { %v604_v1 = vmul.f32 0.17677669, %v599_v0  ;;  %v3595_v2 = vpop.f32.mrb[15].mxu1  ;;  %v605_v3 = vadd.f32 %v603_v62, %v4406_v18 }
 0x56b   :  { %v607_v5 = vsel %vm476_vm2, %v605_v3, -inf  ;;  %v606_v6 = vadd.f32 %v604_v1, %v4411_v22 }
 0x56c   :  { %608 = vmax.xlane.f32.xlu1 %v607_v5 }
 0x56d   :  { %v610_v7 = vsel %vm476_vm2, %v606_v6, -inf }
 0x56e   :  { %611 = vmax.xlane.f32.xlu0 %v610_v7 }
 0x5f9   :  { %v609_v8 = vpop.xlane.xlu1 %608 }
 0x5fa   :  { %v613_v9 = vsub.f32 %v605_v3, %v609_v8 }
 0x5fb   :  { %v612_v10 = vpop.xlane.xlu0 %611 }
 0x5fc   :  { %v615_v11 = vmul.f32 1.442695, %v613_v9  ;;  %v614_v12 = vsub.f32 %v606_v6, %v612_v10 }
 0x5fe   :  { %3971 = vpow2.f32 %v615_v11  ;;  %v617_v16 = vmul.f32 1.442695, %v614_v12 }
 0x600   :  { %3973 = vpow2.f32 %v617_v16 }
 0x608   :  { %v3972_v17 = vpop.eup %3971 }
 0x609   :  { %v619_v19 = vsel %vm476_vm2, %v3972_v17, 0.0 }
 0x60a   :  { %v3974_v20 = vpop.eup %3973  ;;  %620 = vadd.xlane.f32.xlu0 %v619_v19 }
 0x60b   :  { %v622_v21 = vsel %vm476_vm2, %v3974_v20, 0.0 }
 0x60c   :  { %623 = vadd.xlane.f32.xlu1 %v622_v21 }
 0x61d   :  { %797 = vrot.lane.b32.xlu1 %v4392_v15, %s4869_s6 }
 0x620   :  { %631 = vrot.lane.b32.xlu0 %v4390_v14, %s4166_s12 }
 0x621   :  { %795 = vrot.lane.b32.xlu1 %v4388_v13, %s4869_s6 }
 0x697   :  { %v621_v25 = vpop.xlane.xlu0 %620 }
 0x698   :  { %3975 = vrcp.f32 %v621_v25 }
 0x699   :  { %v624_v26 = vpop.xlane.xlu1 %623 }
 0x69a   :  { %3977 = vrcp.f32 %v624_v26 }
 0x69b   :  { %v632_v27 = vpop.permute.xlu0 %631 }
 0x69c   :  { %3597 = vmatpush3.bf16.msra.mxu1 %v632_v27 }
 0x69d   :  { %3610 = vmatprep.subr.bf16.mxu1 %v4163_v4  ;;  %v798_v38 = vpop.permute.xlu1 %797 }
 0x69e   :  { %v803_v42 = vsel %vm424_vm1, %v798_v38, 0 }
 0x6a1   :  { %v796_v47 = vpop.permute.xlu1 %795 }
 0x6a2   :  { %v3976_v28 = vpop.eup %3975 }
 0x6a3   :  { %v627_v31 = vmul.f32 %v3976_v28, %v3972_v17 }
 0x6a4   :  { %v3978_v29 = vpop.eup %3977 }
 0x6a5   :  { %v628_v32 = vmul.f32 %v3978_v29, %v3974_v20 }
 0x6a7   :  { %v629_v34 = vpack.c.bf16 %v628_v32, %v627_v31 }
 0x6a9   :  { %3599 = vmatmul.mubr.msk.bf16.vlgmr.msra.gmra.mrb[16].mxu1 %vm476_vm2, %v629_v34 }
 0x6aa   :  { %3611 = vmatpush3.bf16.msra.mxu1 %v3823_v33  ;;  %3614 = vmatprep.mubr.msk.bf16.mxu1 %vm4165_vm0, %v4163_v4  ;;  %v3828_v33 = vld [vmem:[#allocation4 + $0x28] sm:$0xff]  }
 0x6ab   :  { %3612 = vmatprep.subr.bf16.mxu1 %v4163_v4 }
 0x6ae   :  { %3613 = vmatpush3.bf16.msra.mxu1 %v3824_v35 }
 0x6af   :  { %3624 = vmatprep.subr.bf16.mxu1 %v4163_v4 }
 0x6b1   :  { %3615 = vmatmul.mubr.msk.bf16.vlgmr.msra.gmra.mrb[20].mxu1 %vm424_vm1, %v549_v59 }
 0x6b2   :  { %3626 = vmatprep.mubr.msk.bf16.mxu1 %vm4165_vm0, %v4163_v4 }
 0x77c   :  { %v671_v36 = vpop.f32.mrb[16].mxu1 }
 0x77d   :  { %v3600_v37 = vpop.f32.mrb[17].mxu1 }
 0x77e   :  { %v674_v39 = vpop.f32.mrb[18].mxu1 }
 0x77f   :  { %v682_v40 = vpack.c.bf16 %v674_v39, %v671_v36  ;;  %v3601_v41 = vpop.f32.mrb[19].mxu1 }
 0x781   :  { %3607 = vmatmul.mubr.msk.bf16.vlgmr.msra.gmra.mrb[4].mxu0 %vm424_vm1, %v682_v40 }
 0x782   :  { %3619 = vmatpush3.bf16.xpose.msra.mxu0 %v803_v42  ;;  %3620 = vmatprep.mubr.msk.bf16.mxu0 %vm4165_vm0, %v4163_v4 }
 0x783   :  { %3630 = vmatprep.subr.bf16.mxu0 %v4163_v4 }
 0x784   :  { %v788_v43 = vpop.f32.mrb[20].mxu1 }
 0x785   :  { %v3616_v44 = vpop.f32.mrb[21].mxu1 }
 0x786   :  { %v791_v45 = vpop.f32.mrb[22].mxu1 }
 0x787   :  { %v3617_v46 = vpop.f32.mrb[23].mxu1 }
 0x789   :  { %3621 = vmatmul.mubr.msk.bf16.vlgmr.msra.gmra.mrb[8].mxu0 %vm424_vm1, %v796_v47 }
 0x78a   :  { %3634 = vmatprep.mubr.msk.bf16.mxu0 %vm4165_vm0, %v4163_v4 }
 0x854   :  { %v732_v48 = vpop.f32.mrb[4].mxu0 }
 0x855   :  { %v4462_v49 = vadd.f32 %v788_v43, %v732_v48  ;;  %v3608_v52 = vpop.f32.mrb[5].mxu0 }
 0x856   :  { %v735_v53 = vpop.f32.mrb[6].mxu0 }
 0x857   :  { %v4464_v57 = vadd.f32 %v791_v45, %v735_v53  ;;  %v3609_v59 = vpop.f32.mrb[7].mxu0 }
 0x85c   :  { %v839_v60 = vpop.f32.mrb[8].mxu0 }
 0x85d   :  { %v846_v61 = vmul.f32 0.17677669, %v839_v60  ;;  %v3622_v62 = vpop.f32.mrb[9].mxu0 }
 0x85e   :  { %v842_v63 = vpop.f32.mrb[10].mxu0 }
 0x85f   :  { %v847_v0 = vmul.f32 0.17677669, %v842_v63  ;;  %v3623_v1 = vpop.f32.mrb[11].mxu0  ;;  %v848_v2 = vadd.f32 %v846_v61, %v4406_v18 }
 0x861   :  { %v850_v3 = vsel %vm476_vm2, %v848_v2, -inf  ;;  %v849_v5 = vadd.f32 %v847_v0, %v4411_v22 }
 0x862   :  { %851 = vmax.xlane.f32.xlu1 %v850_v3 }
 0x863   :  { %v853_v6 = vsel %vm476_vm2, %v849_v5, -inf }
 0x864   :  { %854 = vmax.xlane.f32.xlu0 %v853_v6 }
 0x873   :  { %873 = vrot.lane.b32.xlu1 %v4390_v14, %s4869_s6 }
 0x877   :  { %983 = vrot.lane.b32.xlu1 %v4388_v13, %s4167_s29  ;;  %v3827_v13 = vld [vmem:[#allocation4 + $0x20] sm:$0xff]  }
 0x878   :  { %3631 = vmatpush3.bf16.msra.mxu0 %v3827_v13 }
 0x879   :  { %3632 = vmatprep.subr.bf16.mxu0 %v4163_v4 }
 0x87c   :  { %3633 = vmatpush3.bf16.msra.mxu0 %v3828_v33 }
 0x87d   :  { %3644 = vmatprep.subr.bf16.mxu0 %v4163_v4 }
 0x8ef   :  { %v852_v7 = vpop.xlane.xlu1 %851 }
 0x8f0   :  { %v856_v8 = vsub.f32 %v848_v2, %v852_v7 }
 0x8f1   :  { %v855_v9 = vpop.xlane.xlu0 %854 }
 0x8f2   :  { %v858_v10 = vmul.f32 1.442695, %v856_v8  ;;  %v857_v11 = vsub.f32 %v849_v5, %v855_v9 }
 0x8f3   :  { %v874_v12 = vpop.permute.xlu1 %873 }
 0x8f4   :  { %3979 = vpow2.f32 %v858_v10  ;;  %v860_v16 = vmul.f32 1.442695, %v857_v11  ;;  %3625 = vmatpush3.bf16.msra.mxu1 %v874_v12 }
 0x8f5   :  { %3638 = vmatprep.subr.bf16.mxu1 %v4163_v4 }
 0x8f6   :  { %3981 = vpow2.f32 %v860_v16 }
 0x8fe   :  { %v3980_v17 = vpop.eup %3979 }
 0x8ff   :  { %v862_v19 = vsel %vm476_vm2, %v3980_v17, 0.0 }
 0x900   :  { %v3982_v20 = vpop.eup %3981  ;;  %863 = vadd.xlane.f32.xlu0 %v862_v19 }
 0x901   :  { %v865_v21 = vsel %vm476_vm2, %v3982_v20, 0.0 }
 0x904   :  { %866 = vadd.xlane.f32.xlu0 %v865_v21 }
 0x91a   :  { %985 = vrot.lane.b32.xlu0 %v4392_v15, %s4167_s29  ;;  %v984_v15 = vpop.permute.xlu1 %983 }
 0x98d   :  { %v864_v23 = vpop.xlane.xlu0 %863 }
 0x98e   :  { %3983 = vrcp.f32 %v864_v23 }
 0x991   :  { %v867_v24 = vpop.xlane.xlu0 %866 }
 0x992   :  { %3985 = vrcp.f32 %v867_v24 }
 0x995   :  { %v986_v29 = vpop.permute.xlu0 %985 }
 0x996   :  { %v991_v32 = vsel %vm424_vm1, %v986_v29, 0 }
 0x998   :  { %v3984_v25 = vpop.eup %3983 }
 0x999   :  { %v870_v27 = vmul.f32 %v3984_v25, %v3980_v17  ;;  %v3278_v25 = vld [vmem:[%s4847_s7] ss:$0 sm:$0xff] }
 0x99c   :  { %v3986_v26 = vpop.eup %3985 }
 0x99d   :  { %v871_v28 = vmul.f32 %v3986_v26, %v3982_v20 }
 0x99f   :  { %v872_v31 = vpack.c.bf16 %v871_v28, %v870_v27 }
 0x9a1   :  { %3627 = vmatmul.mubr.msk.bf16.vlgmr.msra.gmra.mrb[24].mxu1 %vm476_vm2, %v872_v31 }
 0x9a2   :  { %3639 = vmatpush3.bf16.xpose.msra.mxu1 %v991_v32  ;;  %3640 = vmatprep.mubr.msk.bf16.mxu1 %vm4165_vm0, %v4163_v4 }
 0x9a3   :  { %3650 = vmatprep.subr.bf16.mxu1 %v4163_v4 }
 0x9a9   :  { %3641 = vmatmul.mubr.msk.bf16.vlgmr.msra.gmra.mrb[28].mxu1 %vm424_vm1, %v984_v15 }
 0x9aa   :  { %3654 = vmatprep.mubr.msk.bf16.mxu1 %vm4165_vm0, %v4163_v4 }
 0xa74   :  { %v913_v34 = vpop.f32.mrb[24].mxu1 }
 0xa75   :  { %v3628_v35 = vpop.f32.mrb[25].mxu1 }
 0xa76   :  { %v916_v36 = vpop.f32.mrb[26].mxu1  ;;  %v3831_v35 = vld [vmem:[%s4850_s10] ss:$8 sps:$4 sm:$0xff]  }
 0xa77   :  { %v924_v37 = vpack.c.bf16 %v916_v36, %v913_v34  ;;  %v3629_v38 = vpop.f32.mrb[27].mxu1  ;;  %v3833_v36 = vld [vmem:[%s4850_s10 + $0x4] ss:$8 sps:$4 sm:$0xff]  }
 0xa79   :  { %3635 = vmatmul.mubr.msk.bf16.vlgmr.msra.gmra.mrb[12].mxu0 %vm424_vm1, %v924_v37  ;;  %v3836_v37 = vld [vmem:[%s4850_s10 + $0x14] ss:$8 sps:$4 sm:$0xff]  }
 0xa7a   :  { %3646 = vmatprep.mubr.msk.bf16.mxu0 %vm4165_vm0, %v4163_v4 }
 0xa7c   :  { %v1027_v39 = vpop.f32.mrb[28].mxu1 }
 0xa7d   :  { %v1034_v40 = vmul.f32 0.17677669, %v1027_v39  ;;  %v3642_v41 = vpop.f32.mrb[29].mxu1 }
 0xa7e   :  { %v1030_v42 = vpop.f32.mrb[30].mxu1 }
 0xa7f   :  { %v1035_v43 = vmul.f32 0.17677669, %v1030_v42  ;;  %v3643_v44 = vpop.f32.mrb[31].mxu1  ;;  %v1036_v45 = vadd.f32 %v1034_v40, %v4406_v18 }
 0xa81   :  { %v1038_v46 = vsel %vm476_vm2, %v1036_v45, -inf  ;;  %v1037_v47 = vadd.f32 %v1035_v43, %v4411_v22  ;;  %v3829_v22 = vld [vmem:[#allocation4 + $0x30] sm:$0xff]  }
 0xa82   :  { %1039 = vmax.xlane.f32.xlu1 %v1038_v46  ;;  %3651 = vmatpush3.bf16.msra.mxu1 %v3829_v22  ;;  %v3837_v46 = vld [vmem:[%s4850_s10 + $0x20] ss:$8 sps:$4 sm:$0xff]  }
 0xa83   :  { %v1041_v48 = vsel %vm476_vm2, %v1037_v47, -inf  ;;  %3652 = vmatprep.subr.bf16.mxu1 %v4163_v4 }
 0xa84   :  { %1042 = vmax.xlane.f32.xlu0 %v1041_v48  ;;  %v3840_v48 = vld [vmem:[%s4850_s10 + $0x30] ss:$8 sps:$4 sm:$0xff]  }
 0xb0f   :  { %v1040_v52 = vpop.xlane.xlu1 %1039 }
 0xb10   :  { %v1044_v53 = vsub.f32 %v1036_v45, %v1040_v52  ;;  %v3839_v45 = vld [vmem:[%s4850_s10 + $0x24] ss:$8 sps:$4 sm:$0xff]  }
 0xb11   :  { %v1043_v59 = vpop.xlane.xlu0 %1042  ;;  %v3845_v52 = vld [vmem:[%s4850_s10 + $0x44] ss:$8 sps:$4 sm:$0xff]  }
 0xb12   :  { %v1046_v60 = vmul.f32 1.442695, %v1044_v53  ;;  %v1045_v61 = vsub.f32 %v1037_v47, %v1043_v59  ;;  %v3842_v47 = vld [vmem:[%s4850_s10 + $0x34] ss:$8 sps:$4 sm:$0xff]   ;;  %v3843_v53 = vld [vmem:[%s4850_s10 + $0x40] ss:$8 sps:$4 sm:$0xff]  }
 0xb13   :  { %v3848_v59 = vld [vmem:[%s4850_s10 + $0x54] ss:$8 sps:$4 sm:$0xff]  }
 0xb14   :  { %3987 = vpow2.f32 %v1046_v60  ;;  %v1048_v62 = vmul.f32 1.442695, %v1045_v61  ;;  %v3846_v60 = vld [vmem:[%s4850_s10 + $0x50] ss:$8 sps:$4 sm:$0xff]   ;;  %v3851_v61 = vld [vmem:[%s4850_s10 + $0x64] ss:$8 sps:$4 sm:$0xff]  }
 0xb16   :  { %3989 = vpow2.f32 %v1048_v62  ;;  %v3849_v62 = vld [vmem:[%s4850_s10 + $0x60] ss:$8 sps:$4 sm:$0xff]  }
 0xb1e   :  { %v3988_v63 = vpop.eup %3987 }
 0xb1f   :  { %v1050_v0 = vsel %vm476_vm2, %v3988_v63, 0.0 }
 0xb20   :  { %v3990_v18 = vpop.eup %3989  ;;  %1051 = vadd.xlane.f32.xlu0 %v1050_v0  ;;  %v3852_v0 = vld [vmem:[%s4850_s10 + $0x70] ss:$8 sps:$4 sm:$0xff]  }
 0xb21   :  { %v1053_v1 = vsel %vm476_vm2, %v3990_v18, 0.0 }
 0xb22   :  { %1054 = vadd.xlane.f32.xlu1 %v1053_v1 }
 0xb36   :  { %1061 = vrot.lane.b32.xlu0 %v4390_v14, %s4167_s29 }
 0xb4c   :  { %v974_v2 = vpop.f32.mrb[12].mxu0 }
 0xb4d   :  { %v981_v3 = vadd.f32 %v974_v2, %v4462_v49  ;;  %v3636_v5 = vpop.f32.mrb[13].mxu0  ;;  %v3830_v49 = vld [vmem:[#allocation4 + $0x38] sm:$0xff]  }
 0xb4e   :  { %v977_v6 = vpop.f32.mrb[14].mxu0  ;;  %3653 = vmatpush3.bf16.msra.mxu1 %v3830_v49  ;;  %v3855_v49 = vld [vmem:[#allocation6 + $0x40] sm:$0xff]  }
 0xb4f   :  { %v982_v7 = vadd.f32 %v977_v6, %v4464_v57  ;;  %v3637_v8 = vpop.f32.mrb[15].mxu0  ;;  %3468 = vmatprep.subr.bf16.mxu1 %v3855_v49 }
 0xb50   :  { %v3279_v8 = vld [vmem:[%s4848_s8] ss:$0 sm:$0xff] }
 0xbad   :  { %v1052_v9 = vpop.xlane.xlu0 %1051 }
 0xbae   :  { %3991 = vrcp.f32 %v1052_v9 }
 0xbaf   :  { %v1055_v10 = vpop.xlane.xlu1 %1054 }
 0xbb0   :  { %3993 = vrcp.f32 %v1055_v10 }
 0xbb1   :  { %v1062_v11 = vpop.permute.xlu0 %1061 }
 0xbb2   :  { %3645 = vmatpush3.bf16.msra.mxu0 %v1062_v11 }
 0xbb3   :  { %1331 = vmatprep.subr.bf16.mxu0 %v3833_v36 }
 0xbb8   :  { %v3992_v12 = vpop.eup %3991 }
 0xbb9   :  { %v1058_v16 = vmul.f32 %v3992_v12, %v3988_v63  ;;  %v3854_v63 = vld [vmem:[%s4850_s10 + $0x74] ss:$8 sps:$4 sm:$0xff]   ;;  %v3280_v12 = vld [vmem:[%s4849_s9] ss:$0 sm:$0xff] }
 0xbba   :  { %v3994_v14 = vpop.eup %3993 }
 0xbbb   :  { %v1059_v17 = vmul.f32 %v3994_v14, %v3990_v18 }
 0xbbd   :  { %v1060_v19 = vpack.c.bf16 %v1059_v17, %v1058_v16 }
 0xbbf   :  { %3647 = vmatmul.mubr.msk.bf16.vlgmr.msra.gmra.mrb[16].mxu0 %vm476_vm2, %v1060_v19 }
 0xbc0   :  { %1363 = vmatprep.mubr.bf16.mxu0 %v4164_v30  ;;  %1332 = vmatpush1.bf16.msra.mxu0 %v3831_v35 }
 0xbc1   :  { %1333 = vmatprep.subr.bf16.mxu0 %v3836_v37 }
 0xc92   :  { %v1101_v20 = vpop.f32.mrb[16].mxu0 }
 0xc93   :  { %v3648_v57 = vpop.f32.mrb[17].mxu0 }
 0xc94   :  { %v1104_v21 = vpop.f32.mrb[18].mxu0  ;;  %v3857_v57 = vld [vmem:[#allocation6 + $0x48] sm:$0xff]  }
 0xc95   :  { %v1112_v13 = vpack.c.bf16 %v1104_v21, %v1101_v20  ;;  %v3649_v23 = vpop.f32.mrb[19].mxu0  ;;  %v3856_v20 = vld [vmem:[#allocation6] sm:$0xff]   ;;  %v3858_v21 = vld [vmem:[#allocation6 + $0x8] sm:$0xff]  }
 0xc96   :  { %v3860_v23 = vld [vmem:[#allocation6 + $0x10] sm:$0xff]  }
 0xc97   :  { %3655 = vmatmul.mubr.msk.bf16.vlgmr.msra.gmra.mrb[32].mxu1 %vm424_vm1, %v1112_v13  ;;  %v3859_v13 = vld [vmem:[#allocation6 + $0x50] sm:$0xff]  }
 0xc98   :  { %3469 = vmatpush3.bf16.msra.mxu1 %v3856_v20 }
 0xc99   :  { %3470 = vmatprep.subr.bf16.mxu1 %v3857_v57 }
 0xc9c   :  { %3471 = vmatpush3.bf16.msra.mxu1 %v3858_v21 }
 0xc9d   :  { %3472 = vmatprep.subr.bf16.mxu1 %v3859_v13 }
 0xca0   :  { %3473 = vmatpush3.bf16.msra.mxu1 %v3860_v23 }
 0xd6a   :  { %v1162_v24 = vpop.f32.mrb[32].mxu1 }
 0xd6b   :  { %v1169_v26 = vadd.f32 %v1162_v24, %v981_v3  ;;  %v3656_v27 = vpop.f32.mrb[33].mxu1  ;;  %v3861_v24 = vld [vmem:[#allocation6 + $0x58] sm:$0xff]  }
 0xd6c   :  { %v1165_v28 = vpop.f32.mrb[34].mxu1  ;;  %3474 = vmatprep.subr.bf16.mxu1 %v3861_v24  ;;  %v3864_v27 = vld [vmem:[#allocation6 + $0x20] sm:$0xff]  }
 0xd6d   :  { %v1178_v29 = vadd.f32 %v3278_v25, %v1169_v26  ;;  %v1170_v31 = vadd.f32 %v1165_v28, %v982_v7  ;;  %v3657_v32 = vpop.f32.mrb[35].mxu1  ;;  %v3863_v26 = vld [vmem:[#allocation6 + $0x60] sm:$0xff]   ;;  %v3865_v28 = vld [vmem:[#allocation6 + $0x68] sm:$0xff]  }
 0xd6e   :  { %v3868_v32 = vld [vmem:[#allocation6 + $0x30] sm:$0xff]  }
 0xd6f   :  { %v1179_v15 = vadd.f32 %v3278_v25, %v1170_v31  ;;  %v1180_v33 = vadd.f32 %v1178_v29, %v4362_v50  ;;  %v3834_v50 = vld [vmem:[%s4850_s10 + $0x10] ss:$8 sps:$4 sm:$0xff]   ;;  %v3866_v29 = vld [vmem:[#allocation6 + $0x28] sm:$0xff]  }
 0xd70   :  { %1334 = vmatpush1.bf16.msra.mxu0 %v3834_v50  ;;  %v3862_v25 = vld [vmem:[#allocation6 + $0x18] sm:$0xff]   ;;  %v3867_v31 = vld [vmem:[#allocation6 + $0x70] sm:$0xff]  }
 0xd71   :  { %1184 = vadd.xlane.f32.xlu1 %v1180_v33  ;;  %v1181_v34 = vadd.f32 %v1179_v15, %v4364_v51  ;;  %1335 = vmatprep.subr.bf16.mxu0 %v3839_v45  ;;  %v3869_v15 = vld [vmem:[#allocation6 + $0x78] sm:$0xff]  }
 0xd72   :  { %3475 = vmatpush3.bf16.msra.mxu1 %v3862_v25 }
 0xd73   :  { %3476 = vmatprep.subr.bf16.mxu1 %v3863_v26 }
 0xd74   :  { %1336 = vmatpush1.bf16.msra.mxu0 %v3837_v46 }
 0xd75   :  { %1186 = vadd.xlane.f32.xlu1 %v1181_v34  ;;  %1337 = vmatprep.subr.bf16.mxu0 %v3842_v47 }
 0xd76   :  { %3477 = vmatpush3.bf16.msra.mxu1 %v3864_v27 }
 0xd77   :  { %3478 = vmatprep.subr.bf16.mxu1 %v3865_v28  ;;  %v3297_v28 = vld [vmem:[%s4853_s13] ss:$0 sm:$0xff] }
 0xd78   :  { %1338 = vmatpush1.bf16.msra.mxu0 %v3840_v48 }
 0xd79   :  { %1339 = vmatprep.subr.bf16.mxu0 %v3845_v52 }
 0xd7a   :  { %3479 = vmatpush3.bf16.msra.mxu1 %v3866_v29 }
 0xd7b   :  { %3480 = vmatprep.subr.bf16.mxu1 %v3867_v31 }
 0xd7c   :  { %1340 = vmatpush1.bf16.msra.mxu0 %v3843_v53 }
 0xd7d   :  { %1341 = vmatprep.subr.bf16.mxu0 %v3848_v59 }
 0xd7e   :  { %3481 = vmatpush3.bf16.msra.mxu1 %v3868_v32 }
 0xd7f   :  { %3482 = vmatprep.subr.bf16.mxu1 %v3869_v15 }
 0xd80   :  { %1342 = vmatpush1.bf16.msra.mxu0 %v3846_v60 }
 0xd81   :  { %1343 = vmatprep.subr.bf16.mxu0 %v3851_v61 }
 0xd84   :  { %1344 = vmatpush1.bf16.msra.mxu0 %v3849_v62 }
 0xd85   :  { %1345 = vmatprep.subr.bf16.mxu0 %v3854_v63 }
 0xd88   :  { %1346 = vmatpush1.bf16.msra.mxu0 %v3852_v0 }
 0xdfe   :  { %v1185_v51 = vpop.xlane.xlu1 %1184 }
 0xdff   :  { %v1188_v38 = vmul.f32 0.0078125, %v1185_v51 }
 0xe01   :  { %v1190_v39 = vsub.f32 %v1180_v33, %v1188_v38  ;;  %v3870_v33 = vld [vmem:[#allocation6 + $0x38] sm:$0xff]  }
 0xe02   :  { %v1187_v40 = vpop.xlane.xlu1 %1186  ;;  %3483 = vmatpush3.bf16.msra.mxu1 %v3870_v33 }
 0xe03   :  { %v1189_v41 = vmul.f32 0.0078125, %v1187_v40  ;;  %v1192_v42 = vmul.f32 %v1190_v39, %v1190_v39  ;;  %3658 = vmatprep.subr.bf16.mxu1 %v4163_v4 }
 0xe05   :  { %v1191_v43 = vsub.f32 %v1181_v34, %v1189_v41  ;;  %1194 = vadd.xlane.f32.xlu1 %v1192_v42  ;;  %v1239_v34 = vld [vmem:[%s4851_s11] sm:$0x3] }
 0xe06   :  { %v1244_v35 = vrot.slane %v1239_v34, %v4375_v55  ;;  %v1248_v36 = vrot.slane %v1239_v34, %v4382_v58 }
 0xe07   :  { %v1193_v44 = vmul.f32 %v1191_v43, %v1191_v43 }
 0xe09   :  { %1196 = vadd.xlane.f32.xlu1 %v1193_v44 }
 0xe92   :  { %v1195_v18 = vpop.xlane.xlu1 %1194 }
 0xe93   :  { %v1198_v1 = vmul.f32 0.0078125, %v1195_v18 }
 0xe95   :  { %v1200_v22 = vadd.f32 1e-12, %v1198_v1 }
 0xe96   :  { %v1197_v2 = vpop.xlane.xlu1 %1196 }
 0xe97   :  { %3995 = vrsqrt.f32 %v1200_v22  ;;  %v1199_v3 = vmul.f32 0.0078125, %v1197_v2 }
 0xe99   :  { %v1201_v5 = vadd.f32 1e-12, %v1199_v3 }
 0xe9b   :  { %3997 = vrsqrt.f32 %v1201_v5 }
 0xea1   :  { %v3996_v6 = vpop.eup %3995 }
 0xea2   :  { %v1204_v7 = vmul.f32 %v3996_v6, %v1190_v39 }
 0xea4   :  { %v1212_v11 = vmul.f32 %v3279_v8, %v1204_v7 }
 0xea5   :  { %v3998_v9 = vpop.eup %3997 }
 0xea6   :  { %v1205_v10 = vmul.f32 %v3998_v9, %v1191_v43  ;;  %v4565_v16 = vadd.f32 %v3280_v12, %v1212_v11 }
 0xea8   :  { %v1213_v14 = vmul.f32 %v3279_v8, %v1205_v10 }
 0xeaa   :  { %v4567_v17 = vadd.f32 %v3280_v12, %v1213_v14 }
 0xeac   :  { %v1238_v19 = vpack.c.bf16 %v4567_v17, %v4565_v16 }
 0xeae   :  { %1364 = vmatmul.mubr.bf16.vlgmr.msra.gmra.mrb[20].mxu0 %v1238_v19 }
 0xeaf   :  { %1842 = vmatprep.mubr.bf16.mxu0 %v4164_v30 }
 0xf81   :  { %v1365_v37 = vpop.f32.mrb[20].mxu0 }
 0xf82   :  { %v1366_v50 = vadd.f32 %v1365_v37, %v1244_v35  ;;  %v1367_v51 = vpop.f32.mrb[21].mxu0 }
 0xf83   :  { %v1368_v38 = vadd.f32 %v1367_v51, %v1248_v36  ;;  %v1369_v39 = vpop.f32.mrb[22].mxu0  ;;  %v3873_v51 = vld [vmem:[#allocation2 + $0xc4] ss:$12 sps:$4 sm:$0xff]  }
 0xf84   :  { %v1374_v40 = vmul.f32 %v1366_v50, %v1366_v50  ;;  %v1370_v41 = vadd.f32 %v1369_v39, %v1244_v35  ;;  %v1371_v42 = vpop.f32.mrb[23].mxu0  ;;  %v3877_v39 = vld [vmem:[#allocation2 + $0xdc] ss:$12 sps:$4 sm:$0xff]   ;;  %1810 = vmatprep.subr.bf16.mxu0 %v3873_v51 }
 0xf85   :  { %v1375_v43 = vmul.f32 %v1368_v38, %v1368_v38  ;;  %v1372_v44 = vadd.f32 %v1371_v42, %v1248_v36 }
 0xf86   :  { %v1378_v45 = vmul.f32 %v1374_v40, %v1366_v50  ;;  %v1376_v46 = vmul.f32 %v1370_v41, %v1370_v41  ;;  %v3875_v40 = vld [vmem:[#allocation2 + $0xd8] ss:$12 sps:$4 sm:$0xff]  }
 0xf87   :  { %v1379_v47 = vmul.f32 %v1375_v43, %v1368_v38  ;;  %v1377_v48 = vmul.f32 %v1372_v44, %v1372_v44 }
 0xf88   :  { %v1382_v52 = vmul.f32 0.044715, %v1378_v45  ;;  %v1380_v53 = vmul.f32 %v1376_v46, %v1370_v41 }
 0xf89   :  { %v1383_v59 = vmul.f32 0.044715, %v1379_v47  ;;  %v1381_v60 = vmul.f32 %v1377_v48, %v1372_v44  ;;  %v3878_v47 = vld [vmem:[#allocation2 + $0xe0] ss:$12 sps:$4 sm:$0xff]  }
 0xf8a   :  { %v1386_v61 = vadd.f32 %v1382_v52, %v1366_v50  ;;  %v1384_v62 = vmul.f32 0.044715, %v1380_v53  ;;  %v3881_v48 = vld [vmem:[#allocation2 + $0xf4] ss:$12 sps:$4 sm:$0xff]   ;;  %v3879_v52 = vld [vmem:[#allocation2 + $0xf0] ss:$12 sps:$4 sm:$0xff]  }
 0xf8b   :  { %v1387_v63 = vadd.f32 %v1383_v59, %v1368_v38  ;;  %v1385_v0 = vmul.f32 0.044715, %v1381_v60  ;;  %v3882_v53 = vld [vmem:[#allocation2 + $0xf8] ss:$12 sps:$4 sm:$0xff]   ;;  %v3883_v60 = vld [vmem:[#allocation2 + $0x108] ss:$12 sps:$4 sm:$0xff]  }
 0xf8c   :  { %v1390_v18 = vmul.f32 0.7978846, %v1386_v61  ;;  %v1388_v1 = vadd.f32 %v1384_v62, %v1370_v41  ;;  %v3885_v59 = vld [vmem:[#allocation2 + $0x10c] ss:$12 sps:$4 sm:$0xff]   ;;  %v3886_v61 = vld [vmem:[#allocation2 + $0x110] ss:$12 sps:$4 sm:$0xff]  }
 0xf8d   :  { %v1391_v22 = vmul.f32 0.7978846, %v1387_v63  ;;  %v1389_v2 = vadd.f32 %v1385_v0, %v1372_v44  ;;  %v3889_v62 = vld [vmem:[#allocation2 + $0x124] ss:$12 sps:$4 sm:$0xff]   ;;  %v3887_v63 = vld [vmem:[#allocation2 + $0x120] ss:$12 sps:$4 sm:$0xff]  }
 0xf8e   :  { %3999 = vtanh.f32 %v1390_v18  ;;  %v1392_v3 = vmul.f32 0.7978846, %v1388_v1  ;;  %v3890_v0 = vld [vmem:[#allocation2 + $0x128] ss:$12 sps:$4 sm:$0xff]   ;;  %v3891_v1 = vld [vmem:[#allocation2 + $0x138] ss:$12 sps:$4 sm:$0xff]  }
 0xf8f   :  { %4001 = vtanh.f32 %v1391_v22  ;;  %v1393_v5 = vmul.f32 0.7978846, %v1389_v2  ;;  %v3893_v18 = vld [vmem:[#allocation2 + $0x13c] ss:$12 sps:$4 sm:$0xff]   ;;  %v3894_v22 = vld [vmem:[#allocation2 + $0x140] ss:$12 sps:$4 sm:$0xff]  }
 0xf90   :  { %4003 = vtanh.f32 %v1392_v3  ;;  %v3897_v2 = vld [vmem:[#allocation2 + $0x154] ss:$12 sps:$4 sm:$0xff]   ;;  %v3895_v3 = vld [vmem:[#allocation2 + $0x150] ss:$12 sps:$4 sm:$0xff]  }
 0xf91   :  { %4005 = vtanh.f32 %v1393_v5  ;;  %v3898_v5 = vld [vmem:[#allocation2 + $0x158] ss:$12 sps:$4 sm:$0xff]  }
 0xf98   :  { %v4000_v6 = vpop.eup %3999 }
 0xf99   :  { %v4002_v7 = vpop.eup %4001  ;;  %v1398_v8 = vadd.f32 1.0, %v4000_v6  ;;  %v3901_v6 = vld [vmem:[#allocation2 + $0x16c] ss:$12 sps:$4 sm:$0xff]  }
 0xf9a   :  { %v4004_v9 = vpop.eup %4003  ;;  %v1399_v10 = vadd.f32 1.0, %v4002_v7  ;;  %v3899_v7 = vld [vmem:[#allocation2 + $0x168] ss:$12 sps:$4 sm:$0xff]  }
 0xf9b   :  { %v4006_v11 = vpop.eup %4005  ;;  %v1402_v12 = vmul.f32 0.5, %v1398_v8  ;;  %v1400_v14 = vadd.f32 1.0, %v4004_v9  ;;  %v3902_v8 = vld [vmem:[#allocation2 + $0x170] ss:$12 sps:$4 sm:$0xff]  }
 0xf9c   :  { %v1401_v19 = vadd.f32 1.0, %v4006_v11  ;;  %v1403_v49 = vmul.f32 0.5, %v1399_v10 }
 0xf9d   :  { %v1404_v20 = vmul.f32 0.5, %v1400_v14  ;;  %v1406_v21 = vmul.f32 %v1402_v12, %v1366_v50  ;;  %v3871_v50 = vld [vmem:[#allocation2 + $0xc0] ss:$12 sps:$4 sm:$0xff]  }
 0xf9e   :  { %v1405_v57 = vmul.f32 0.5, %v1401_v19  ;;  %v1407_v23 = vmul.f32 %v1403_v49, %v1368_v38  ;;  %v3874_v38 = vld [vmem:[#allocation2 + $0xc8] ss:$12 sps:$4 sm:$0xff]   ;;  %1811 = vmatpush1.bf16.msra.mxu0 %v3871_v50 }
 0xf9f   :  { %v1408_v13 = vmul.f32 %v1404_v20, %v1370_v41  ;;  %1812 = vmatprep.subr.bf16.mxu0 %v3877_v39 }
 0xfa0   :  { %v1409_v24 = vmul.f32 %v1405_v57, %v1372_v44  ;;  %v3314_v57 = vld [vmem:[%s4854_s14] ss:$0 sm:$0xff] }
 0xfa1   :  { %v1442_v25 = vpack.c.bf16 %v1408_v13, %v1406_v21 }
 0xfa2   :  { %v1443_v26 = vpack.c.bf16 %v1409_v24, %v1407_v23  ;;  %1813 = vmatpush1.bf16.msra.mxu0 %v3875_v40  ;;  %v3315_v24 = vld [vmem:[%s4855_s15] ss:$0 sm:$0xff] }
 0xfa3   :  { %1814 = vmatprep.subr.bf16.mxu0 %v3881_v48 }
 0xfa4   :  { %1579 = vmatprep.mubr.bf16.mxu1 %v1443_v26 }
 0xfa5   :  { %1580 = vmatmul.mubr.bf16.vlgmr.msra.gmra.mrb[36].mxu1 %v1442_v25 }
 0xfa6   :  { %3674 = vmatprep.mubr.msk.bf16.mxu1 %vm4165_vm0, %v4163_v4  ;;  %3659 = vmatpush3.bf16.msra.mxu1 %v3874_v38 }
 0xfa7   :  { %3660 = vmatprep.subr.bf16.mxu1 %v4163_v4  ;;  %1815 = vmatpush1.bf16.msra.mxu0 %v3879_v52 }
 0xfa8   :  { %1816 = vmatprep.subr.bf16.mxu0 %v3885_v59 }
 0xfaa   :  { %3661 = vmatpush3.bf16.msra.mxu1 %v3878_v47 }
 0xfab   :  { %3662 = vmatprep.subr.bf16.mxu1 %v4163_v4  ;;  %1817 = vmatpush1.bf16.msra.mxu0 %v3883_v60 }
 0xfac   :  { %1818 = vmatprep.subr.bf16.mxu0 %v3889_v62  ;;  %v4649_v62 = vld [vmem:[%s4872_s0] sm:$0xff] }
 0xfae   :  { %3663 = vmatpush3.bf16.msra.mxu1 %v3882_v53 }
 0xfaf   :  { %3664 = vmatprep.subr.bf16.mxu1 %v4163_v4  ;;  %1819 = vmatpush1.bf16.msra.mxu0 %v3887_v63 }
 0xfb0   :  { %1820 = vmatprep.subr.bf16.mxu0 %v3893_v18  ;;  %v4656_v18 = vld [vmem:[%s4872_s0 + $0x8] sm:$0xff] }
 0xfb2   :  { %3665 = vmatpush3.bf16.msra.mxu1 %v3886_v61 }
 0xfb3   :  { %3666 = vmatprep.subr.bf16.mxu1 %v4163_v4  ;;  %1821 = vmatpush1.bf16.msra.mxu0 %v3891_v1 }
 0xfb4   :  { %1822 = vmatprep.subr.bf16.mxu0 %v3897_v2 }
 0xfb6   :  { %3667 = vmatpush3.bf16.msra.mxu1 %v3890_v0 }
 0xfb7   :  { %3668 = vmatprep.subr.bf16.mxu1 %v4163_v4  ;;  %1823 = vmatpush1.bf16.msra.mxu0 %v3895_v3 }
 0xfb8   :  { %1824 = vmatprep.subr.bf16.mxu0 %v3901_v6 }
 0xfba   :  { %3669 = vmatpush3.bf16.msra.mxu1 %v3894_v22 }
 0xfbb   :  { %3670 = vmatprep.subr.bf16.mxu1 %v4163_v4  ;;  %1825 = vmatpush1.bf16.msra.mxu0 %v3899_v7 }
 0xfbc   :  { %3678 = vmatprep.subr.bf16.mxu0 %v4163_v4 }
 0xfbe   :  { %3671 = vmatpush3.bf16.msra.mxu1 %v3898_v5 }
 0xfbf   :  { %3672 = vmatprep.subr.bf16.mxu1 %v4163_v4 }
 0xfc2   :  { %3673 = vmatpush3.bf16.msra.mxu1 %v3902_v8 }
 0xfc3   :  { %3684 = vmatprep.subr.bf16.mxu1 %v4163_v4 }
0x1078   :  { %v3484_v27 = vpop.f32.mrb[36].mxu1 }
0x1079   :  { %v3485_v29 = vpop.f32.mrb[37].mxu1 }
0x107a   :  { %v3486_v31 = vadd.f32 %v3485_v29, %v3484_v27  ;;  %v3487_v32 = vpop.f32.mrb[38].mxu1  ;;  %v3316_v29 = vld [vmem:[%s4845_s5 + $0x3] sm:$0x7] }
0x107b   :  { %v3488_v15 = vpop.f32.mrb[39].mxu1 }
0x107c   :  { %v1582_v33 = vadd.f32 %v3486_v31, %v3297_v28  ;;  %v3489_v34 = vadd.f32 %v3488_v15, %v3487_v32  ;;  %v1670_v31 = vrot.slane %v3316_v29, %v4375_v55  ;;  %v1678_v32 = vrot.slane %v3316_v29, %v205_v56 }
0x107e   :  { %v1585_v35 = vadd.f32 %v3489_v34, %v3297_v28  ;;  %v1588_v36 = vadd.f32 %v1582_v33, %v4565_v16  ;;  %v1674_v34 = vrot.slane %v3316_v29, %v4382_v58 }
0x1080   :  { %1592 = vadd.xlane.f32.xlu1 %v1588_v36  ;;  %v1589_v37 = vadd.f32 %v1585_v35, %v4567_v17 }
0x1084   :  { %1594 = vadd.xlane.f32.xlu1 %v1589_v37 }
0x110d   :  { %v1593_v41 = vpop.xlane.xlu1 %1592 }
0x110e   :  { %v1596_v42 = vmul.f32 0.0078125, %v1593_v41 }
0x1110   :  { %v4586_v43 = vsub.f32 %v1588_v36, %v1596_v42 }
0x1111   :  { %v1595_v16 = vpop.xlane.xlu1 %1594 }
0x1112   :  { %v1597_v44 = vmul.f32 0.0078125, %v1595_v16  ;;  %v1600_v17 = vmul.f32 %v4586_v43, %v4586_v43 }
0x1114   :  { %v1599_v45 = vsub.f32 %v1589_v37, %v1597_v44  ;;  %1602 = vadd.xlane.f32.xlu0 %v1600_v17 }
0x1116   :  { %v1601_v46 = vmul.f32 %v1599_v45, %v1599_v45 }
0x1118   :  { %1604 = vadd.xlane.f32.xlu1 %v1601_v46 }
0x11a1   :  { %v1603_v9 = vpop.xlane.xlu0 %1602 }
0x11a2   :  { %v1606_v10 = vmul.f32 0.0078125, %v1603_v9 }
0x11a4   :  { %v1608_v11 = vadd.f32 1e-12, %v1606_v10 }
0x11a5   :  { %v1605_v12 = vpop.xlane.xlu1 %1604 }
0x11a6   :  { %4007 = vrsqrt.f32 %v1608_v11  ;;  %v1607_v14 = vmul.f32 0.0078125, %v1605_v12 }
0x11a8   :  { %v1609_v19 = vadd.f32 1e-12, %v1607_v14 }
0x11aa   :  { %4009 = vrsqrt.f32 %v1609_v19 }
0x11b0   :  { %v4008_v49 = vpop.eup %4007 }
0x11b1   :  { %v1612_v20 = vmul.f32 %v4008_v49, %v4586_v43 }
0x11b3   :  { %v1620_v23 = vmul.f32 %v3314_v57, %v1612_v20 }
0x11b4   :  { %v4010_v21 = vpop.eup %4009 }
0x11b5   :  { %v1613_v13 = vmul.f32 %v4010_v21, %v1599_v45  ;;  %v4605_v26 = vadd.f32 %v3315_v24, %v1620_v23 }
0x11b7   :  { %v1621_v25 = vmul.f32 %v3314_v57, %v1613_v13 }
0x11b9   :  { %v4607_v27 = vadd.f32 %v3315_v24, %v1621_v25 }
0x11bb   :  { %v1663_v28 = vpack.c.bf16 %v4607_v27, %v4605_v26 }
0x11bd   :  { %1843 = vmatmul.mubr.bf16.vlgmr.msra.gmra.mrb[24].mxu0 %v1663_v28  ;;  %3675 = vmatmul.mubr.bf16.vlgmr.msra.gmra.mrb[40].mxu1 %v1663_v28 }
0x11be   :  { %3680 = vmatprep.mubr.msk.bf16.mxu0 %vm4165_vm0, %v4163_v4  ;;  %3686 = vmatprep.mubr.msk.bf16.mxu1 %vm4165_vm0, %v4163_v4 }
0x1290   :  { %v1844_v15 = vpop.f32.mrb[24].mxu0  ;;  %v1887_v33 = vpop.f32.mrb[40].mxu1 }
0x1291   :  { %v1846_v35 = vpop.f32.mrb[25].mxu0  ;;  %v3676_v36 = vpop.f32.mrb[41].mxu1  ;;  %v1845_v51 = vadd.f32 %v1844_v15, %v1670_v31  ;;  %v1888_v38 = vadd.f32 %v1887_v33, %v1678_v32 }
0x1292   :  { %v1848_v37 = vpop.f32.mrb[26].mxu0  ;;  %v1890_v50 = vpop.f32.mrb[42].mxu1  ;;  %v1847_v43 = vadd.f32 %v1846_v35, %v1674_v34 }
0x1293   :  { %v1849_v39 = vadd.f32 %v1848_v37, %v1670_v31  ;;  %v1891_v40 = vadd.f32 %v1890_v50, %v1678_v32  ;;  %v1850_v41 = vpop.f32.mrb[27].mxu0  ;;  %v3677_v42 = vpop.f32.mrb[43].mxu1 }
0x1294   :  { %v1851_v16 = vadd.f32 %v1850_v41, %v1674_v34 }
0x1295   :  { %v4622_v44 = vpack.c.bf16 %v1849_v39, %v1845_v51  ;;  %v4624_v54 = vpack.c.bf16 %v1891_v40, %v1888_v38 }
0x1296   :  { %v4626_v56 = vpack.c.bf16 %v1851_v16, %v1847_v43  ;;  %v3905_v43 = vld [vmem:[#allocation4 + $0x50] sm:$0xff]   ;;  %v3906_v16 = vld [vmem:[#allocation4 + $0x58] sm:$0xff]  }
0x1297   :  { %3685 = vmatpush3.bf16.msra.mxu1 %v4624_v54 }
0x1298   :  { %2025 = vrot.lane.b32.xlu1 %v4626_v56, %s4166_s12  ;;  %v1900_v17 = vsel %vm424_vm1, %v4626_v56, 0  ;;  %3696 = vmatprep.subr.bf16.mxu1 %v4163_v4 }
0x1299   :  { %3679 = vmatpush3.bf16.xpose.msra.mxu0 %v1900_v17 }
0x129a   :  { %3690 = vmatprep.subr.bf16.mxu0 %v4163_v4 }
0x129c   :  { %2022 = vrot.lane.b32.xlu1 %v4622_v44, %s4166_s12 }
0x12a0   :  { %3681 = vmatmul.mubr.msk.bf16.vlgmr.msra.gmra.mrb[28].mxu0 %vm424_vm1, %v4622_v44 }
0x12a1   :  { %3692 = vmatprep.mubr.msk.bf16.mxu0 %vm4165_vm0, %v4163_v4 }
0x130a   :  { %v2026_v45 = vpop.permute.xlu1 %2025 }
0x130b   :  { %v2031_v46 = vsel %vm424_vm1, %v2026_v45, 0 }
0x130c   :  { %3691 = vmatpush3.bf16.xpose.msra.mxu0 %v2031_v46 }
0x130d   :  { %3702 = vmatprep.subr.bf16.mxu0 %v4163_v4 }
0x130e   :  { %v2023_v47 = vpop.permute.xlu1 %2022 }
0x1313   :  { %3693 = vmatmul.mubr.msk.bf16.vlgmr.msra.gmra.mrb[32].mxu0 %vm424_vm1, %v2023_v47 }
0x1314   :  { %3706 = vmatprep.mubr.msk.bf16.mxu0 %vm4165_vm0, %v4163_v4  ;;  %3703 = vmatpush3.bf16.msra.mxu0 %v3905_v43 }
0x1315   :  { %3704 = vmatprep.subr.bf16.mxu0 %v4163_v4 }
0x1318   :  { %3705 = vmatpush3.bf16.msra.mxu0 %v3906_v16 }
0x1319   :  { %3718 = vmatprep.subr.bf16.mxu0 %v4163_v4 }
0x1373   :  { %v1936_v48 = vpop.f32.mrb[28].mxu0 }
0x1374   :  { %v1943_v52 = vmul.f32 0.17677669, %v1936_v48  ;;  %v3682_v53 = vpop.f32.mrb[29].mxu0 }
0x1375   :  { %v1939_v59 = vpop.f32.mrb[30].mxu0 }
0x1376   :  { %v1944_v60 = vmul.f32 0.17677669, %v1939_v59  ;;  %v3683_v61 = vpop.f32.mrb[31].mxu0  ;;  %v1945_v63 = vadd.f32 %v4649_v62, %v1943_v52  ;;  %v3903_v59 = vld [vmem:[#allocation4 + $0x40] sm:$0xff]  }
0x1377   :  { %v3904_v61 = vld [vmem:[#allocation4 + $0x48] sm:$0xff]  }
0x1378   :  { %v1947_v0 = vsel %vm476_vm2, %v1945_v63, -inf  ;;  %v1946_v1 = vadd.f32 %v4656_v18, %v1944_v60 }
0x1379   :  { %1948 = vmax.xlane.f32.xlu1 %v1947_v0 }
0x137a   :  { %v1950_v22 = vsel %vm476_vm2, %v1946_v1, -inf }
0x137b   :  { %1951 = vmax.xlane.f32.xlu0 %v1950_v22 }
0x138a   :  { %2268 = vrot.lane.b32.xlu1 %v4626_v56, %s4869_s6 }
0x138e   :  { %2266 = vrot.lane.b32.xlu1 %v4622_v44, %s4869_s6 }
0x13e6   :  { %v2067_v2 = vpop.f32.mrb[32].mxu0 }
0x13e7   :  { %v2074_v3 = vmul.f32 0.17677669, %v2067_v2  ;;  %v3694_v5 = vpop.f32.mrb[33].mxu0 }
0x13e8   :  { %v2070_v6 = vpop.f32.mrb[34].mxu0 }
0x13e9   :  { %v2075_v7 = vmul.f32 0.17677669, %v2070_v6  ;;  %v3695_v8 = vpop.f32.mrb[35].mxu0  ;;  %v2076_v9 = vadd.f32 %v4649_v62, %v2074_v3 }
0x13eb   :  { %v2078_v10 = vsel %vm476_vm2, %v2076_v9, -inf  ;;  %v2077_v11 = vadd.f32 %v4656_v18, %v2075_v7 }
0x13ec   :  { %2079 = vmax.xlane.f32.xlu0 %v2078_v10 }
0x13ed   :  { %v2081_v12 = vsel %vm476_vm2, %v2077_v11, -inf }
0x13f0   :  { %2082 = vmax.xlane.f32.xlu0 %v2081_v12 }
0x1406   :  { %v1949_v14 = vpop.xlane.xlu1 %1948 }
0x1407   :  { %v1953_v19 = vsub.f32 %v1945_v63, %v1949_v14 }
0x1408   :  { %v1952_v49 = vpop.xlane.xlu0 %1951 }
0x1409   :  { %v1955_v20 = vmul.f32 1.442695, %v1953_v19  ;;  %v1954_v57 = vsub.f32 %v1946_v1, %v1952_v49 }
0x140a   :  { %v2269_v6 = vpop.permute.xlu1 %2268 }
0x140b   :  { %4011 = vpow2.f32 %v1955_v20  ;;  %v1957_v21 = vmul.f32 1.442695, %v1954_v57  ;;  %v2274_v10 = vsel %vm424_vm1, %v2269_v6, 0 }
0x140d   :  { %4013 = vpow2.f32 %v1957_v21 }
0x1415   :  { %v4012_v13 = vpop.eup %4011 }
0x1416   :  { %v1959_v23 = vsel %vm476_vm2, %v4012_v13, 0.0 }
0x1417   :  { %v4014_v24 = vpop.eup %4013  ;;  %1960 = vadd.xlane.f32.xlu0 %v1959_v23 }
0x1418   :  { %v1962_v25 = vsel %vm476_vm2, %v4014_v24, 0.0 }
0x141b   :  { %1963 = vadd.xlane.f32.xlu0 %v1962_v25 }
0x1479   :  { %v2080_v28 = vpop.xlane.xlu0 %2079 }
0x147a   :  { %v2084_v29 = vsub.f32 %v2076_v9, %v2080_v28 }
0x147c   :  { %v2086_v31 = vmul.f32 1.442695, %v2084_v29 }
0x147d   :  { %v2083_v32 = vpop.xlane.xlu0 %2082 }
0x147e   :  { %4015 = vpow2.f32 %v2086_v31  ;;  %v2085_v15 = vsub.f32 %v2077_v11, %v2083_v32  ;;  %v2267_v11 = vpop.permute.xlu1 %2266 }
0x1480   :  { %v2088_v33 = vmul.f32 1.442695, %v2085_v15 }
0x1482   :  { %4017 = vpow2.f32 %v2088_v33 }
0x1488   :  { %v4016_v34 = vpop.eup %4015 }
0x1489   :  { %v2090_v35 = vsel %vm476_vm2, %v4016_v34, 0.0 }
0x148a   :  { %2091 = vadd.xlane.f32.xlu0 %v2090_v35 }
0x148c   :  { %v4018_v36 = vpop.eup %4017 }
0x148d   :  { %v2093_v37 = vsel %vm476_vm2, %v4018_v36, 0.0 }
0x148e   :  { %2094 = vadd.xlane.f32.xlu0 %v2093_v37 }
0x14a4   :  { %2102 = vrot.lane.b32.xlu0 %v4624_v54, %s4166_s12  ;;  %v1961_v50 = vpop.xlane.xlu0 %1960 }
0x14a5   :  { %4019 = vrcp.f32 %v1961_v50 }
0x14a8   :  { %v1964_v51 = vpop.xlane.xlu0 %1963 }
0x14a9   :  { %4021 = vrcp.f32 %v1964_v51 }
0x14af   :  { %v4020_v38 = vpop.eup %4019 }
0x14b0   :  { %v1967_v40 = vmul.f32 %v4020_v38, %v4012_v13 }
0x14b3   :  { %v4022_v39 = vpop.eup %4021 }
0x14b4   :  { %v1968_v41 = vmul.f32 %v4022_v39, %v4014_v24 }
0x14b6   :  { %v1969_v42 = vpack.c.bf16 %v1968_v41, %v1967_v40 }
0x14b8   :  { %3687 = vmatmul.mubr.msk.bf16.vlgmr.msra.gmra.mrb[44].mxu1 %vm476_vm2, %v1969_v42 }
0x14b9   :  { %3698 = vmatprep.mubr.msk.bf16.mxu1 %vm4165_vm0, %v4163_v4 }
0x1517   :  { %v2092_v17 = vpop.xlane.xlu0 %2091 }
0x1518   :  { %4023 = vrcp.f32 %v2092_v17 }
0x151b   :  { %v2095_v45 = vpop.xlane.xlu0 %2094 }
0x151c   :  { %4025 = vrcp.f32 %v2095_v45 }
0x151f   :  { %v2103_v46 = vpop.permute.xlu0 %2102 }
0x1520   :  { %3697 = vmatpush3.bf16.msra.mxu1 %v2103_v46 }
0x1521   :  { %3710 = vmatprep.subr.bf16.mxu1 %v4163_v4 }
0x1522   :  { %v4024_v47 = vpop.eup %4023 }
0x1523   :  { %v2098_v52 = vmul.f32 %v4024_v47, %v4016_v34 }
0x1526   :  { %v4026_v48 = vpop.eup %4025 }
0x1527   :  { %v2099_v53 = vmul.f32 %v4026_v48, %v4018_v36 }
0x1529   :  { %v2100_v60 = vpack.c.bf16 %v2099_v53, %v2098_v52 }
0x152b   :  { %3699 = vmatmul.mubr.msk.bf16.vlgmr.msra.gmra.mrb[48].mxu1 %vm476_vm2, %v2100_v60 }
0x152c   :  { %3711 = vmatpush3.bf16.msra.mxu1 %v3903_v59  ;;  %3714 = vmatprep.mubr.msk.bf16.mxu1 %vm4165_vm0, %v4163_v4 }
0x152d   :  { %3712 = vmatprep.subr.bf16.mxu1 %v4163_v4 }
0x1530   :  { %3713 = vmatpush3.bf16.msra.mxu1 %v3904_v61 }
0x1531   :  { %3724 = vmatprep.subr.bf16.mxu1 %v4163_v4 }
0x158b   :  { %v2008_v63 = vpop.f32.mrb[44].mxu1 }
0x158c   :  { %v3688_v0 = vpop.f32.mrb[45].mxu1 }
0x158d   :  { %v2011_v1 = vpop.f32.mrb[46].mxu1 }
0x158e   :  { %v2020_v22 = vpack.c.bf16 %v2011_v1, %v2008_v63  ;;  %v3689_v2 = vpop.f32.mrb[47].mxu1  ;;  %v3908_v63 = vld [vmem:[#allocation4 + $0x68] sm:$0xff]  }
0x1590   :  { %3715 = vmatmul.mubr.msk.bf16.vlgmr.msra.gmra.mrb[52].mxu1 %vm424_vm1, %v2020_v22 }
0x1591   :  { %3726 = vmatprep.mubr.msk.bf16.mxu1 %vm4165_vm0, %v4163_v4 }
0x15fe   :  { %v2142_v3 = vpop.f32.mrb[48].mxu1 }
0x15ff   :  { %v3700_v5 = vpop.f32.mrb[49].mxu1 }
0x1600   :  { %v2145_v7 = vpop.f32.mrb[50].mxu1 }
0x1601   :  { %v2153_v8 = vpack.c.bf16 %v2145_v7, %v2142_v3  ;;  %v3701_v9 = vpop.f32.mrb[51].mxu1 }
0x1603   :  { %3707 = vmatmul.mubr.msk.bf16.vlgmr.msra.gmra.mrb[36].mxu0 %vm424_vm1, %v2153_v8 }
0x1604   :  { %3719 = vmatpush3.bf16.xpose.msra.mxu0 %v2274_v10  ;;  %3720 = vmatprep.mubr.msk.bf16.mxu0 %vm4165_vm0, %v4163_v4 }
0x1605   :  { %3730 = vmatprep.subr.bf16.mxu0 %v4163_v4 }
0x160b   :  { %3721 = vmatmul.mubr.msk.bf16.vlgmr.msra.gmra.mrb[40].mxu0 %vm424_vm1, %v2267_v11 }
0x160c   :  { %3734 = vmatprep.mubr.msk.bf16.mxu0 %vm4165_vm0, %v4163_v4 }
0x1663   :  { %v2259_v12 = vpop.f32.mrb[52].mxu1 }
0x1664   :  { %v3716_v14 = vpop.f32.mrb[53].mxu1 }
0x1665   :  { %v2262_v19 = vpop.f32.mrb[54].mxu1 }
0x1666   :  { %v3717_v49 = vpop.f32.mrb[55].mxu1 }
0x16d6   :  { %v2203_v20 = vpop.f32.mrb[36].mxu0 }
0x16d7   :  { %v4696_v57 = vadd.f32 %v2259_v12, %v2203_v20  ;;  %v3708_v21 = vpop.f32.mrb[37].mxu0 }
0x16d8   :  { %v2206_v13 = vpop.f32.mrb[38].mxu0 }
0x16d9   :  { %v4698_v23 = vadd.f32 %v2262_v19, %v2206_v13  ;;  %v3709_v24 = vpop.f32.mrb[39].mxu0 }
0x16de   :  { %v2310_v25 = vpop.f32.mrb[40].mxu0 }
0x16df   :  { %v2317_v28 = vmul.f32 0.17677669, %v2310_v25  ;;  %v3722_v29 = vpop.f32.mrb[41].mxu0 }
0x16e0   :  { %v2313_v31 = vpop.f32.mrb[42].mxu0 }
0x16e1   :  { %v2318_v32 = vmul.f32 0.17677669, %v2313_v31  ;;  %v3723_v15 = vpop.f32.mrb[43].mxu0  ;;  %v2319_v33 = vadd.f32 %v4649_v62, %v2317_v28 }
0x16e3   :  { %v2321_v34 = vsel %vm476_vm2, %v2319_v33, -inf  ;;  %v2320_v35 = vadd.f32 %v4656_v18, %v2318_v32  ;;  %v3909_v32 = vld [vmem:[#allocation4 + $0x70] sm:$0xff]  }
0x16e4   :  { %2322 = vmax.xlane.f32.xlu0 %v2321_v34 }
0x16e5   :  { %v2324_v36 = vsel %vm476_vm2, %v2320_v35, -inf }
0x16e6   :  { %2325 = vmax.xlane.f32.xlu1 %v2324_v36 }
0x16f7   :  { %2456 = vrot.lane.b32.xlu1 %v4626_v56, %s4167_s29 }
0x16fb   :  { %2454 = vrot.lane.b32.xlu1 %v4622_v44, %s4167_s29  ;;  %v3907_v44 = vld [vmem:[#allocation4 + $0x60] sm:$0xff]  }
0x16fc   :  { %3731 = vmatpush3.bf16.msra.mxu0 %v3907_v44 }
0x16fd   :  { %3732 = vmatprep.subr.bf16.mxu0 %v4163_v4 }
0x1700   :  { %3733 = vmatpush3.bf16.msra.mxu0 %v3908_v63  ;;  %v3913_v63 = vld [vmem:[%s4850_s10 + $0x84] ss:$8 sps:$4 sm:$0xff]  }
0x1701   :  { %3744 = vmatprep.subr.bf16.mxu0 %v4163_v4 }
0x1771   :  { %v2323_v37 = vpop.xlane.xlu0 %2322 }
0x1772   :  { %v2327_v50 = vsub.f32 %v2319_v33, %v2323_v37 }
0x1773   :  { %v2326_v51 = vpop.xlane.xlu1 %2325 }
0x1774   :  { %v2329_v38 = vmul.f32 1.442695, %v2327_v50  ;;  %v2328_v39 = vsub.f32 %v2320_v35, %v2326_v51 }
0x1776   :  { %4027 = vpow2.f32 %v2329_v38  ;;  %v2331_v40 = vmul.f32 1.442695, %v2328_v39 }
0x1777   :  { %v2457_v53 = vpop.permute.xlu1 %2456 }
0x1778   :  { %4029 = vpow2.f32 %v2331_v40  ;;  %v2462_v60 = vsel %vm424_vm1, %v2457_v53, 0 }
0x177b   :  { %v2455_v61 = vpop.permute.xlu1 %2454 }
0x1780   :  { %v4028_v41 = vpop.eup %4027 }
0x1781   :  { %v2333_v42 = vsel %vm476_vm2, %v4028_v41, 0.0 }
0x1782   :  { %v4030_v43 = vpop.eup %4029  ;;  %2334 = vadd.xlane.f32.xlu0 %v2333_v42  ;;  %v3910_v42 = vld [vmem:[#allocation4 + $0x78] sm:$0xff]  }
0x1783   :  { %v2336_v16 = vsel %vm476_vm2, %v4030_v43, 0.0 }
0x1786   :  { %2337 = vadd.xlane.f32.xlu0 %v2336_v16 }
0x179c   :  { %2344 = vrot.lane.b32.xlu0 %v4624_v54, %s4869_s6 }
0x180f   :  { %v2335_v56 = vpop.xlane.xlu0 %2334 }
0x1810   :  { %4031 = vrcp.f32 %v2335_v56 }
0x1813   :  { %v2338_v17 = vpop.xlane.xlu0 %2337 }
0x1814   :  { %4033 = vrcp.f32 %v2338_v17  ;;  %v3362_v17 = vld [vmem:[%s4847_s7 + $0x1] ss:$0 sm:$0xff] }
0x1817   :  { %v2345_v45 = vpop.permute.xlu0 %2344 }
0x1818   :  { %3725 = vmatpush3.bf16.msra.mxu1 %v2345_v45 }
0x1819   :  { %3738 = vmatprep.subr.bf16.mxu1 %v4163_v4 }
0x181a   :  { %v4032_v46 = vpop.eup %4031 }
0x181b   :  { %v2341_v48 = vmul.f32 %v4032_v46, %v4028_v41 }
0x181e   :  { %v4034_v47 = vpop.eup %4033 }
0x181f   :  { %v2342_v52 = vmul.f32 %v4034_v47, %v4030_v43 }
0x1821   :  { %v2343_v59 = vpack.c.bf16 %v2342_v52, %v2341_v48 }
0x1823   :  { %3727 = vmatmul.mubr.msk.bf16.vlgmr.msra.gmra.mrb[56].mxu1 %vm476_vm2, %v2343_v59 }
0x1824   :  { %3739 = vmatpush3.bf16.xpose.msra.mxu1 %v2462_v60  ;;  %3740 = vmatprep.mubr.msk.bf16.mxu1 %vm4165_vm0, %v4163_v4 }
0x1825   :  { %3750 = vmatprep.subr.bf16.mxu1 %v4163_v4 }
0x182b   :  { %3741 = vmatmul.mubr.msk.bf16.vlgmr.msra.gmra.mrb[60].mxu1 %vm424_vm1, %v2455_v61  ;;  %v3911_v61 = vld [vmem:[%s4850_s10 + $0x80] ss:$8 sps:$4 sm:$0xff]  }
0x182c   :  { %3754 = vmatprep.mubr.msk.bf16.mxu1 %vm4165_vm0, %v4163_v4  ;;  %3751 = vmatpush3.bf16.msra.mxu1 %v3909_v32 }
0x182d   :  { %3752 = vmatprep.subr.bf16.mxu1 %v4163_v4 }
0x1830   :  { %3753 = vmatpush3.bf16.msra.mxu1 %v3910_v42  ;;  %v3938_v42 = vld [vmem:[#allocation6 + $0x88] sm:$0xff]  }
0x18f6   :  { %v2384_v0 = vpop.f32.mrb[56].mxu1 }
0x18f7   :  { %v3728_v1 = vpop.f32.mrb[57].mxu1 }
0x18f8   :  { %v2387_v22 = vpop.f32.mrb[58].mxu1 }
0x18f9   :  { %v2395_v2 = vpack.c.bf16 %v2387_v22, %v2384_v0  ;;  %v3729_v3 = vpop.f32.mrb[59].mxu1  ;;  %v3916_v0 = vld [vmem:[%s4850_s10 + $0x94] ss:$8 sps:$4 sm:$0xff]  }
0x18fb   :  { %3735 = vmatmul.mubr.msk.bf16.vlgmr.msra.gmra.mrb[44].mxu0 %vm424_vm1, %v2395_v2 }
0x18fc   :  { %3746 = vmatprep.mubr.msk.bf16.mxu0 %vm4165_vm0, %v4163_v4 }
0x18fe   :  { %v2498_v5 = vpop.f32.mrb[60].mxu1 }
0x18ff   :  { %v2505_v6 = vmul.f32 0.17677669, %v2498_v5  ;;  %v3742_v7 = vpop.f32.mrb[61].mxu1 }
0x1900   :  { %v2501_v8 = vpop.f32.mrb[62].mxu1 }
0x1901   :  { %v2506_v9 = vmul.f32 0.17677669, %v2501_v8  ;;  %v3743_v10 = vpop.f32.mrb[63].mxu1  ;;  %v2507_v11 = vadd.f32 %v4649_v62, %v2505_v6  ;;  %v3919_v8 = vld [vmem:[%s4850_s10 + $0xa4] ss:$8 sps:$4 sm:$0xff]  }
0x1902   :  { %v3922_v10 = vld [vmem:[%s4850_s10 + $0xb4] ss:$8 sps:$4 sm:$0xff]  }
0x1903   :  { %v2509_v12 = vsel %vm476_vm2, %v2507_v11, -inf  ;;  %v2508_v14 = vadd.f32 %v4656_v18, %v2506_v9  ;;  %v3917_v9 = vld [vmem:[%s4850_s10 + $0xa0] ss:$8 sps:$4 sm:$0xff]  }
0x1904   :  { %2510 = vmax.xlane.f32.xlu1 %v2509_v12  ;;  %v3925_v12 = vld [vmem:[%s4850_s10 + $0xc4] ss:$8 sps:$4 sm:$0xff]  }
0x1905   :  { %v2512_v19 = vsel %vm476_vm2, %v2508_v14, -inf }
0x1906   :  { %2513 = vmax.xlane.f32.xlu0 %v2512_v19  ;;  %v3928_v19 = vld [vmem:[%s4850_s10 + $0xd4] ss:$8 sps:$4 sm:$0xff]  }
0x1915   :  { %2532 = vrot.lane.b32.xlu1 %v4624_v54, %s4167_s29 }
0x1991   :  { %v2511_v49 = vpop.xlane.xlu1 %2510 }
0x1992   :  { %v2515_v20 = vsub.f32 %v2507_v11, %v2511_v49  ;;  %v3920_v11 = vld [vmem:[%s4850_s10 + $0xb0] ss:$8 sps:$4 sm:$0xff]  }
0x1993   :  { %v2514_v21 = vpop.xlane.xlu0 %2513  ;;  %v3926_v49 = vld [vmem:[%s4850_s10 + $0xd0] ss:$8 sps:$4 sm:$0xff]  }
0x1994   :  { %v2517_v13 = vmul.f32 1.442695, %v2515_v20  ;;  %v2516_v24 = vsub.f32 %v2508_v14, %v2514_v21  ;;  %v3923_v14 = vld [vmem:[%s4850_s10 + $0xc0] ss:$8 sps:$4 sm:$0xff]   ;;  %v3931_v20 = vld [vmem:[%s4850_s10 + $0xe4] ss:$8 sps:$4 sm:$0xff]  }
0x1995   :  { %v2533_v25 = vpop.permute.xlu1 %2532  ;;  %v3929_v21 = vld [vmem:[%s4850_s10 + $0xe0] ss:$8 sps:$4 sm:$0xff]  }
0x1996   :  { %4035 = vpow2.f32 %v2517_v13  ;;  %v2519_v28 = vmul.f32 1.442695, %v2516_v24  ;;  %3745 = vmatpush3.bf16.msra.mxu0 %v2533_v25  ;;  %v3934_v13 = vld [vmem:[%s4850_s10 + $0xf4] ss:$8 sps:$4 sm:$0xff]   ;;  %v3932_v24 = vld [vmem:[%s4850_s10 + $0xf0] ss:$8 sps:$4 sm:$0xff]  }
0x1997   :  { %2807 = vmatprep.subr.bf16.mxu0 %v3913_v63 }
0x1998   :  { %4037 = vpow2.f32 %v2519_v28 }
0x19a0   :  { %v4036_v62 = vpop.eup %4035 }
0x19a1   :  { %v2521_v18 = vsel %vm476_vm2, %v4036_v62, 0.0 }
0x19a2   :  { %v4038_v29 = vpop.eup %4037  ;;  %2522 = vadd.xlane.f32.xlu0 %v2521_v18 }
0x19a3   :  { %v2524_v31 = vsel %vm476_vm2, %v4038_v29, 0.0 }
0x19a6   :  { %2525 = vadd.xlane.f32.xlu0 %v2524_v31 }
0x19ce   :  { %v2445_v54 = vpop.f32.mrb[44].mxu0 }
0x19cf   :  { %v2452_v15 = vadd.f32 %v2445_v54, %v4696_v57  ;;  %v3736_v33 = vpop.f32.mrb[45].mxu0 }
0x19d0   :  { %v2448_v34 = vpop.f32.mrb[46].mxu0 }
0x19d1   :  { %v2453_v35 = vadd.f32 %v2448_v34, %v4698_v23  ;;  %v3737_v36 = vpop.f32.mrb[47].mxu0 }
0x19d2   :  { %v3366_v36 = vld [vmem:[%s4849_s9 + $0x1] ss:$0 sm:$0xff] }
0x1a2f   :  { %v2523_v37 = vpop.xlane.xlu0 %2522 }
0x1a30   :  { %4039 = vrcp.f32 %v2523_v37 }
0x1a33   :  { %v2526_v50 = vpop.xlane.xlu0 %2525 }
0x1a34   :  { %4041 = vrcp.f32 %v2526_v50 }
0x1a3a   :  { %v4040_v51 = vpop.eup %4039 }
0x1a3b   :  { %v2529_v39 = vmul.f32 %v4040_v51, %v4036_v62 }
0x1a3e   :  { %v4042_v38 = vpop.eup %4041 }
0x1a3f   :  { %v2530_v40 = vmul.f32 %v4042_v38, %v4038_v29 }
0x1a41   :  { %v2531_v41 = vpack.c.bf16 %v2530_v40, %v2529_v39  ;;  %v3935_v39 = vld [vmem:[#allocation6 + $0xc0] sm:$0xff]  }
0x1a42   :  { %v3936_v40 = vld [vmem:[#allocation6 + $0x80] sm:$0xff]   ;;  %3527 = vmatprep.subr.bf16.mxu1 %v3935_v39 }
0x1a43   :  { %3747 = vmatmul.mubr.msk.bf16.vlgmr.msra.gmra.mrb[48].mxu0 %vm476_vm2, %v2531_v41  ;;  %v3937_v41 = vld [vmem:[#allocation6 + $0xc8] sm:$0xff]  }
0x1a44   :  { %2839 = vmatprep.mubr.bf16.mxu0 %v4164_v30  ;;  %2808 = vmatpush1.bf16.msra.mxu0 %v3911_v61 }
0x1a45   :  { %2809 = vmatprep.subr.bf16.mxu0 %v3916_v0 }
0x1b16   :  { %v2572_v57 = vpop.f32.mrb[48].mxu0 }
0x1b17   :  { %v3748_v43 = vpop.f32.mrb[49].mxu0 }
0x1b18   :  { %v2575_v16 = vpop.f32.mrb[50].mxu0  ;;  %v3940_v43 = vld [vmem:[#allocation6 + $0x90] sm:$0xff]  }
0x1b19   :  { %v2583_v23 = vpack.c.bf16 %v2575_v16, %v2572_v57  ;;  %v3749_v44 = vpop.f32.mrb[51].mxu0  ;;  %v3939_v57 = vld [vmem:[#allocation6 + $0xd0] sm:$0xff]   ;;  %v3941_v16 = vld [vmem:[#allocation6 + $0xd8] sm:$0xff]  }
0x1b1a   :  { %v3943_v44 = vld [vmem:[#allocation6 + $0xe0] sm:$0xff]  }
0x1b1b   :  { %3755 = vmatmul.mubr.msk.bf16.vlgmr.msra.gmra.mrb[64].mxu1 %vm424_vm1, %v2583_v23  ;;  %v3942_v23 = vld [vmem:[#allocation6 + $0x98] sm:$0xff]  }
0x1b1c   :  { %3528 = vmatpush3.bf16.msra.mxu1 %v3936_v40 }
0x1b1d   :  { %3529 = vmatprep.subr.bf16.mxu1 %v3937_v41 }
0x1b20   :  { %3530 = vmatpush3.bf16.msra.mxu1 %v3938_v42 }
0x1b21   :  { %3531 = vmatprep.subr.bf16.mxu1 %v3939_v57 }
0x1b24   :  { %3532 = vmatpush3.bf16.msra.mxu1 %v3940_v43  ;;  %v3401_v43 = vld [vmem:[%s4853_s13 + $0x1] ss:$0 sm:$0xff] }
0x1b25   :  { %3533 = vmatprep.subr.bf16.mxu1 %v3941_v16 }
0x1b28   :  { %3534 = vmatpush3.bf16.msra.mxu1 %v3942_v23 }
0x1b29   :  { %3535 = vmatprep.subr.bf16.mxu1 %v3943_v44 }
0x1bee   :  { %v2633_v56 = vpop.f32.mrb[64].mxu1 }
0x1bef   :  { %v2640_v45 = vadd.f32 %v2633_v56, %v2452_v15  ;;  %v3756_v46 = vpop.f32.mrb[65].mxu1  ;;  %v3365_v15 = vld [vmem:[%s4848_s8 + $0x1] ss:$0 sm:$0xff] }
0x1bf0   :  { %v2636_v47 = vpop.f32.mrb[66].mxu1  ;;  %v3944_v56 = vld [vmem:[#allocation6 + $0xa0] sm:$0xff]   ;;  %v3947_v46 = vld [vmem:[#allocation6 + $0xf0] sm:$0xff]  }
0x1bf1   :  { %v2650_v48 = vadd.f32 %v3362_v17, %v2640_v45  ;;  %v2641_v52 = vadd.f32 %v2636_v47, %v2453_v35  ;;  %v3757_v30 = vpop.f32.mrb[67].mxu1  ;;  %3536 = vmatpush3.bf16.msra.mxu1 %v3944_v56  ;;  %v3946_v45 = vld [vmem:[#allocation6 + $0xa8] sm:$0xff]   ;;  %v3948_v47 = vld [vmem:[#allocation6 + $0xb0] sm:$0xff]  }
0x1bf2   :  { %v3383_v30 = vld [vmem:[%s4851_s11 + $0x2] sm:$0x3] }
0x1bf3   :  { %v2651_v53 = vadd.f32 %v3362_v17, %v2641_v52  ;;  %v2652_v59 = vadd.f32 %v2650_v48, %v4605_v26  ;;  %v3914_v26 = vld [vmem:[%s4850_s10 + $0x90] ss:$8 sps:$4 sm:$0xff]   ;;  %v3945_v17 = vld [vmem:[#allocation6 + $0xe8] sm:$0xff]  }
0x1bf4   :  { %2810 = vmatpush1.bf16.msra.mxu0 %v3914_v26  ;;  %3537 = vmatprep.subr.bf16.mxu1 %v3945_v17  ;;  %v3949_v48 = vld [vmem:[#allocation6 + $0xf8] sm:$0xff]  }
0x1bf5   :  { %2658 = vadd.xlane.f32.xlu0 %v2652_v59  ;;  %v2653_v60 = vadd.f32 %v2651_v53, %v4607_v27  ;;  %2811 = vmatprep.subr.bf16.mxu0 %v3919_v8  ;;  %v3950_v52 = vld [vmem:[#allocation6 + $0xb8] sm:$0xff]   ;;  %v2720_v53 = vrot.slane %v3383_v30, %v4375_v55 }
0x1bf6   :  { %3538 = vmatpush3.bf16.msra.mxu1 %v3946_v45 }
0x1bf7   :  { %3539 = vmatprep.subr.bf16.mxu1 %v3947_v46 }
0x1bf8   :  { %2812 = vmatpush1.bf16.msra.mxu0 %v3917_v9 }
0x1bf9   :  { %2660 = vadd.xlane.f32.xlu0 %v2653_v60  ;;  %2813 = vmatprep.subr.bf16.mxu0 %v3922_v10 }
0x1bfa   :  { %3540 = vmatpush3.bf16.msra.mxu1 %v3948_v47 }
0x1bfb   :  { %3541 = vmatprep.subr.bf16.mxu1 %v3949_v48 }
0x1bfc   :  { %2814 = vmatpush1.bf16.msra.mxu0 %v3920_v11 }
0x1bfd   :  { %2815 = vmatprep.subr.bf16.mxu0 %v3925_v12 }
0x1bfe   :  { %3542 = vmatpush3.bf16.msra.mxu1 %v3950_v52  ;;  %v3951_v52 = vld [vmem:[#allocation7] sm:$0xff]  }
0x1c00   :  { %2816 = vmatpush1.bf16.msra.mxu0 %v3923_v14 }
0x1c01   :  { %2817 = vmatprep.subr.bf16.mxu0 %v3928_v19 }
0x1c04   :  { %2818 = vmatpush1.bf16.msra.mxu0 %v3926_v49 }
0x1c05   :  { %2819 = vmatprep.subr.bf16.mxu0 %v3931_v20 }
0x1c08   :  { %2820 = vmatpush1.bf16.msra.mxu0 %v3929_v21 }
0x1c09   :  { %2821 = vmatprep.subr.bf16.mxu0 %v3934_v13 }
0x1c0c   :  { %2822 = vmatpush1.bf16.msra.mxu0 %v3932_v24 }
0x1c0d   :  { %3758 = vmatprep.subr.bf16.mxu0 %v4163_v4 }
0x1c82   :  { %v2659_v27 = vpop.xlane.xlu0 %2658 }
0x1c83   :  { %v2662_v1 = vmul.f32 0.0078125, %v2659_v27 }
0x1c85   :  { %v2664_v22 = vsub.f32 %v2652_v59, %v2662_v1  ;;  %v2724_v59 = vrot.slane %v3383_v30, %v4382_v58 }
0x1c86   :  { %v2661_v2 = vpop.xlane.xlu0 %2660 }
0x1c87   :  { %v2663_v3 = vmul.f32 0.0078125, %v2661_v2  ;;  %v2666_v5 = vmul.f32 %v2664_v22, %v2664_v22 }
0x1c89   :  { %v2665_v6 = vsub.f32 %v2653_v60, %v2663_v3  ;;  %2668 = vadd.xlane.f32.xlu0 %v2666_v5 }
0x1c8b   :  { %v2667_v7 = vmul.f32 %v2665_v6, %v2665_v6 }
0x1c8d   :  { %2670 = vadd.xlane.f32.xlu0 %v2667_v7 }
0x1d16   :  { %v2669_v25 = vpop.xlane.xlu0 %2668 }
0x1d17   :  { %v2672_v28 = vmul.f32 0.0078125, %v2669_v25 }
0x1d19   :  { %v2674_v62 = vadd.f32 1e-12, %v2672_v28 }
0x1d1a   :  { %v2671_v18 = vpop.xlane.xlu0 %2670 }
0x1d1b   :  { %4043 = vrsqrt.f32 %v2674_v62  ;;  %v2673_v29 = vmul.f32 0.0078125, %v2671_v18 }
0x1d1d   :  { %v2675_v31 = vadd.f32 1e-12, %v2673_v29 }
0x1d1f   :  { %4045 = vrsqrt.f32 %v2675_v31 }
0x1d25   :  { %v4044_v32 = vpop.eup %4043 }
0x1d26   :  { %v2678_v54 = vmul.f32 %v4044_v32, %v2664_v22 }
0x1d28   :  { %v2686_v35 = vmul.f32 %v3365_v15, %v2678_v54 }
0x1d29   :  { %v4046_v33 = vpop.eup %4045 }
0x1d2a   :  { %v2679_v34 = vmul.f32 %v4046_v33, %v2665_v6  ;;  %v4800_v50 = vadd.f32 %v3366_v36, %v2686_v35 }
0x1d2c   :  { %v2687_v37 = vmul.f32 %v3365_v15, %v2679_v34 }
0x1d2e   :  { %v4802_v51 = vadd.f32 %v3366_v36, %v2687_v37 }
0x1d30   :  { %v2713_v38 = vpack.c.bf16 %v4802_v51, %v4800_v50 }
0x1d32   :  { %2840 = vmatmul.mubr.bf16.vlgmr.msra.gmra.mrb[52].mxu0 %v2713_v38 }
0x1d33   :  { %3774 = vmatprep.mubr.msk.bf16.mxu0 %vm4165_vm0, %v4163_v4  ;;  %3759 = vmatpush3.bf16.msra.mxu0 %v3951_v52 }
0x1d34   :  { %3760 = vmatprep.subr.bf16.mxu0 %v4163_v4 }
0x1e05   :  { %v2841_v60 = vpop.f32.mrb[52].mxu0 }
0x1e06   :  { %v2842_v61 = vadd.f32 %v2841_v60, %v2720_v53  ;;  %v2843_v63 = vpop.f32.mrb[53].mxu0 }
0x1e07   :  { %v2844_v0 = vadd.f32 %v2843_v63, %v2724_v59  ;;  %v2845_v26 = vpop.f32.mrb[54].mxu0 }
0x1e08   :  { %v2850_v27 = vmul.f32 %v2842_v61, %v2842_v61  ;;  %v2846_v1 = vadd.f32 %v2845_v26, %v2720_v53  ;;  %v2847_v22 = vpop.f32.mrb[55].mxu0 }
0x1e09   :  { %v2851_v2 = vmul.f32 %v2844_v0, %v2844_v0  ;;  %v2848_v3 = vadd.f32 %v2847_v22, %v2724_v59  ;;  %v3956_v22 = vld [vmem:[#allocation7 + $0x28] sm:$0xff]  }
0x1e0a   :  { %v2854_v5 = vmul.f32 %v2850_v27, %v2842_v61  ;;  %v2852_v6 = vmul.f32 %v2846_v1, %v2846_v1  ;;  %v3952_v27 = vld [vmem:[#allocation7 + $0x8] sm:$0xff]  }
0x1e0b   :  { %v2855_v7 = vmul.f32 %v2851_v2, %v2844_v0  ;;  %v2853_v8 = vmul.f32 %v2848_v3, %v2848_v3  ;;  %3761 = vmatpush3.bf16.msra.mxu0 %v3952_v27  ;;  %v3957_v2 = vld [vmem:[#allocation7 + $0x30] sm:$0xff]  }
0x1e0c   :  { %v2858_v9 = vmul.f32 0.044715, %v2854_v5  ;;  %v2856_v10 = vmul.f32 %v2852_v6, %v2846_v1  ;;  %3762 = vmatprep.subr.bf16.mxu0 %v4163_v4 }
0x1e0d   :  { %v2859_v11 = vmul.f32 0.044715, %v2855_v7  ;;  %v2857_v55 = vmul.f32 %v2853_v8, %v2848_v3 }
0x1e0e   :  { %v2862_v12 = vadd.f32 %v2858_v9, %v2842_v61  ;;  %v2860_v58 = vmul.f32 0.044715, %v2856_v10 }
0x1e0f   :  { %v2863_v14 = vadd.f32 %v2859_v11, %v2844_v0  ;;  %v2861_v19 = vmul.f32 0.044715, %v2857_v55 }
0x1e10   :  { %v2866_v49 = vmul.f32 0.7978846, %v2862_v12  ;;  %v2864_v20 = vadd.f32 %v2860_v58, %v2846_v1  ;;  %v3420_v12 = vld [vmem:[%s4854_s14 + $0x1] ss:$0 sm:$0xff] }
0x1e11   :  { %v2867_v21 = vmul.f32 0.7978846, %v2863_v14  ;;  %v2865_v13 = vadd.f32 %v2861_v19, %v2848_v3 }
0x1e12   :  { %4047 = vtanh.f32 %v2866_v49  ;;  %v2868_v24 = vmul.f32 0.7978846, %v2864_v20 }
0x1e13   :  { %4049 = vtanh.f32 %v2867_v21  ;;  %v2869_v25 = vmul.f32 0.7978846, %v2865_v13 }
0x1e14   :  { %4051 = vtanh.f32 %v2868_v24  ;;  %v3422_v24 = vld [vmem:[%s4857_s17] ss:$0 sm:$0xff] }
0x1e15   :  { %4053 = vtanh.f32 %v2869_v25 }
0x1e1c   :  { %v4048_v28 = vpop.eup %4047 }
0x1e1d   :  { %v4050_v62 = vpop.eup %4049  ;;  %v2874_v18 = vadd.f32 1.0, %v4048_v28 }
0x1e1e   :  { %v4052_v29 = vpop.eup %4051  ;;  %v2875_v31 = vadd.f32 1.0, %v4050_v62 }
0x1e1f   :  { %v4054_v32 = vpop.eup %4053  ;;  %v2878_v54 = vmul.f32 0.5, %v2874_v18  ;;  %v2876_v15 = vadd.f32 1.0, %v4052_v29 }
0x1e20   :  { %v2877_v33 = vadd.f32 1.0, %v4054_v32  ;;  %v2879_v34 = vmul.f32 0.5, %v2875_v31 }
0x1e21   :  { %v2880_v35 = vmul.f32 0.5, %v2876_v15  ;;  %v2882_v37 = vmul.f32 %v2878_v54, %v2842_v61 }
0x1e22   :  { %v2881_v36 = vmul.f32 0.5, %v2877_v33  ;;  %v2883_v39 = vmul.f32 %v2879_v34, %v2844_v0 }
0x1e23   :  { %v2884_v38 = vmul.f32 %v2880_v35, %v2846_v1  ;;  %v3955_v1 = vld [vmem:[#allocation7 + $0x20] sm:$0xff]  }
0x1e24   :  { %v2885_v40 = vmul.f32 %v2881_v36, %v2848_v3  ;;  %v3958_v3 = vld [vmem:[#allocation7 + $0x38] sm:$0xff]  }
0x1e25   :  { %v2919_v41 = vpack.c.bf16 %v2884_v38, %v2882_v37 }
0x1e26   :  { %v2920_v42 = vpack.c.bf16 %v2885_v40, %v2883_v39 }
0x1e28   :  { %3057 = vmatprep.mubr.bf16.mxu1 %v2920_v42 }
0x1e29   :  { %3058 = vmatmul.mubr.bf16.vlgmr.msra.gmra.mrb[68].mxu1 %v2919_v41 }
0x1efc   :  { %v3543_v57 = vpop.f32.mrb[68].mxu1 }
0x1efd   :  { %v3544_v16 = vpop.f32.mrb[69].mxu1 }
0x1efe   :  { %v3545_v23 = vadd.f32 %v3544_v16, %v3543_v57  ;;  %v3546_v44 = vpop.f32.mrb[70].mxu1 }
0x1eff   :  { %v3547_v56 = vpop.f32.mrb[71].mxu1 }
0x1f00   :  { %v3060_v17 = vadd.f32 %v3545_v23, %v3401_v43  ;;  %v3548_v45 = vadd.f32 %v3547_v56, %v3546_v44 }
0x1f02   :  { %v3063_v46 = vadd.f32 %v3548_v45, %v3401_v43  ;;  %v3066_v47 = vadd.f32 %v3060_v17, %v4800_v50  ;;  %v3953_v50 = vld [vmem:[#allocation7 + $0x10] sm:$0xff]  }
0x1f03   :  { %3763 = vmatpush3.bf16.msra.mxu0 %v3953_v50 }
0x1f04   :  { %3072 = vadd.xlane.f32.xlu1 %v3066_v47  ;;  %v3067_v48 = vadd.f32 %v3063_v46, %v4802_v51  ;;  %3764 = vmatprep.subr.bf16.mxu0 %v4163_v4  ;;  %v3954_v51 = vld [vmem:[#allocation7 + $0x18] sm:$0xff]  }
0x1f06   :  { %3074 = vadd.xlane.f32.xlu0 %v3067_v48 }
0x1f07   :  { %3765 = vmatpush3.bf16.msra.mxu0 %v3954_v51 }
0x1f08   :  { %3766 = vmatprep.subr.bf16.mxu0 %v4163_v4 }
0x1f0b   :  { %3767 = vmatpush3.bf16.msra.mxu0 %v3955_v1 }
0x1f0c   :  { %3768 = vmatprep.subr.bf16.mxu0 %v4163_v4 }
0x1f0f   :  { %3769 = vmatpush3.bf16.msra.mxu0 %v3956_v22 }
0x1f10   :  { %3770 = vmatprep.subr.bf16.mxu0 %v4163_v4 }
0x1f13   :  { %3771 = vmatpush3.bf16.msra.mxu0 %v3957_v2 }
0x1f14   :  { %3772 = vmatprep.subr.bf16.mxu0 %v4163_v4  ;;  %v3421_v4 = vld [vmem:[%s4855_s15 + $0x1] ss:$0 sm:$0xff] }
0x1f17   :  { %3773 = vmatpush3.bf16.msra.mxu0 %v3958_v3 }
0x1f91   :  { %v3073_v30 = vpop.xlane.xlu1 %3072 }
0x1f92   :  { %v3076_v53 = vmul.f32 0.0078125, %v3073_v30 }
0x1f93   :  { %v3075_v59 = vpop.xlane.xlu0 %3074 }
0x1f94   :  { %v3078_v60 = vsub.f32 %v3066_v47, %v3076_v53  ;;  %v3077_v61 = vmul.f32 0.0078125, %v3075_v59 }
0x1f96   :  { %v3079_v63 = vsub.f32 %v3067_v48, %v3077_v61  ;;  %v3080_v0 = vmul.f32 %v3078_v60, %v3078_v60 }
0x1f98   :  { %3082 = vadd.xlane.f32.xlu0 %v3080_v0  ;;  %v3081_v26 = vmul.f32 %v3079_v63, %v3079_v63 }
0x1f9c   :  { %3084 = vadd.xlane.f32.xlu0 %v3081_v26 }
0x2025   :  { %v3083_v5 = vpop.xlane.xlu0 %3082 }
0x2026   :  { %v3086_v6 = vmul.f32 0.0078125, %v3083_v5 }
0x2028   :  { %v3088_v7 = vadd.f32 1e-12, %v3086_v6 }
0x2029   :  { %v3085_v8 = vpop.xlane.xlu0 %3084 }
0x202a   :  { %4055 = vrsqrt.f32 %v3088_v7  ;;  %v3087_v9 = vmul.f32 0.0078125, %v3085_v8 }
0x202c   :  { %v3089_v10 = vadd.f32 1e-12, %v3087_v9 }
0x202e   :  { %4057 = vrsqrt.f32 %v3089_v10 }
0x2034   :  { %v4056_v11 = vpop.eup %4055 }
0x2035   :  { %v3092_v55 = vmul.f32 %v4056_v11, %v3078_v60 }
0x2037   :  { %v3100_v19 = vmul.f32 %v3420_v12, %v3092_v55 }
0x2038   :  { %v4058_v58 = vpop.eup %4057 }
0x2039   :  { %v3093_v14 = vmul.f32 %v4058_v58, %v3079_v63  ;;  %v3108_v20 = vadd.f32 %v3421_v4, %v3100_v19 }
0x203b   :  { %v3101_v49 = vmul.f32 %v3420_v12, %v3093_v14 }
0x203d   :  { %v3109_v21 = vadd.f32 %v3421_v4, %v3101_v49 }
0x203f   :  { %v3126_v13 = vpack.c.bf16 %v3109_v21, %v3108_v20 }
0x2041   :  { %3775 = vmatmul.mubr.bf16.vlgmr.msra.gmra.mrb[56].mxu0 %v3126_v13 }
0x2114   :  { %v3216_v25 = vpop.f32.mrb[56].mxu0 }
0x2115   :  { %v3217_v28 = vadd.f32 %v3422_v24, %v3216_v25  ;;  %v3776_v62 = vpop.f32.mrb[57].mxu0 }
0x2116   :  { %v3219_v18 = vpop.f32.mrb[58].mxu0 }
0x2117   :  { %3223 = vst [vmem:[%s4858_s18] sm:$0xff] %v3217_v28  ;;  %v3220_v29 = vadd.f32 %v3422_v24, %v3219_v18  ;;  %v3777_v31 = vpop.f32.mrb[59].mxu0 }
0x2119   :  { %3224 = vst [vmem:[%s4858_s18 + $0x8] sm:$0xff] %v3220_v29 }
0x211a   :  { %3229 = vsyncpa [#allocation3], 1 }
0x211b   :  { %3230 = vsyncpa [#allocation5], 1 }
0x211c   :  { %3231 = vsyncpa [#allocation8], 1 }

</bundles_post_ra>
